<compile_context>
chip_gen: v7x
topology: tpu7x:2x2x1
jax: 0.10.0
libtpu: 0.0.40
codegen_flags: <defaults>
</compile_context>

<pallas_src>
import functools

import jax
import jax.numpy as jnp
from jax.experimental import pallas as pl
from jax.experimental.pallas import tpu as pltpu

LN_EPS = 1e-5


def _layernorm(x, gamma, beta):
    # f32 statistics (matches torch LayerNorm, eps=1e-5)
    mean = jnp.mean(x, axis=-1, keepdims=True)
    xc = x - mean
    var = jnp.mean(xc * xc, axis=-1, keepdims=True)
    return xc * jax.lax.rsqrt(var + LN_EPS) * gamma + beta


# -----------------------------------------------------------------------------
# Kernel: one grid step == one transformer layer (attention + SwiGLU blocks).
# The activation (B*N, D) stays resident in a VMEM scratch across layers; the
# final LayerNorm is applied and written out at the last layer.
# -----------------------------------------------------------------------------
def gated_transformer_kernel(
        x_ref,
        attn_g_ref, attn_b_ref, wqkv_ref, wo_ref, bo_ref,
        ff_g_ref, ff_b_ref, w1_ref, b1_ref, w2_ref, b2_ref,
        norm_g_ref, norm_b_ref,
        o_ref,
        x_sc,
        *, batch, seq, heads, dim_head, mlp_dim):
    layer = pl.program_id(0)
    rows, _ = x_ref.shape                  # rows == batch * seq
    hd = heads * dim_head
    cdt = wqkv_ref.dtype                   # matmul-input dtype (bf16)

    # Load the input once; afterwards the activation lives in VMEM scratch.
    @pl.when(layer == 0)
    def _():
        x_sc[...] = x_ref[...].astype(jnp.float32)

    x = x_sc[...]                          # (B*N, D) f32

    # ---------------- x = x + Attention(LayerNorm(x)) ----------------
    xn = _layernorm(x, attn_g_ref[0], attn_b_ref[0])              # f32
    # Fused QKV projection: ONE matmul over all B*N rows, contraction depth D.
    qkv = jnp.dot(xn.astype(cdt), wqkv_ref[0],
                  preferred_element_type=jnp.float32)             # (B*N, 3*H*dh)

    ctx_heads = []
    for h in range(heads):                 # static unroll; einsums batched over B
        q = qkv[:, h * dim_head:(h + 1) * dim_head]
        k = qkv[:, hd + h * dim_head: hd + (h + 1) * dim_head]
        v = qkv[:, 2 * hd + h * dim_head: 2 * hd + (h + 1) * dim_head]
        q = q.reshape(batch, seq, dim_head).astype(cdt)
        k = k.reshape(batch, seq, dim_head).astype(cdt)
        v = v.reshape(batch, seq, dim_head).astype(cdt)
        # softmax scale is already folded into the Q weight columns
        dots = jnp.einsum('bnd,bmd->bnm', q, k,
                          preferred_element_type=jnp.float32)     # (B, N, N) f32
        dots = dots - jnp.max(dots, axis=-1, keepdims=True)
        e = jnp.exp(dots)
        p = e * pl.reciprocal(jnp.sum(e, axis=-1, keepdims=True), approx=True)
        ctx_heads.append(
            jnp.einsum('bnm,bmd->bnd', p.astype(cdt), v,
                       preferred_element_type=jnp.float32))       # (B, N, dh)
    # 'b h n d -> b n (h d)': lane-axis concat of the per-head contexts.
    ctx = jnp.concatenate(ctx_heads, axis=-1).reshape(rows, hd)   # (B*N, H*dh)
    # Single fused output projection (contraction H*dh) + residual.
    x = x + jnp.dot(ctx.astype(cdt), wo_ref[0],
                    preferred_element_type=jnp.float32) + bo_ref[0]

    # ---------------- x = x + SwiGLU(LayerNorm(x)) ----------------
    xn = _layernorm(x, ff_g_ref[0], ff_b_ref[0]).astype(cdt)      # (B*N, D)
    up = jnp.dot(xn, w1_ref[0],
                 preferred_element_type=jnp.float32) + b1_ref[0]  # (B*N, 2*mlp) lane-dense
    gate = up[:, :mlp_dim]
    val = up[:, mlp_dim:]
    hmid = (gate * jax.nn.sigmoid(gate)) * val                    # SiLU(gate)*x, f32
    x = x + jnp.dot(hmid.astype(cdt), w2_ref[0],
                    preferred_element_type=jnp.float32) + b2_ref[0]

    x_sc[...] = x                          # carry activation to the next layer

    # ---------------- final LayerNorm (last layer only) ----------------
    @pl.when(layer == pl.num_programs(0) - 1)
    def _():
        o_ref[...] = _layernorm(x, norm_g_ref[...], norm_b_ref[...])


# -----------------------------------------------------------------------------
# Wrapper
# -----------------------------------------------------------------------------
def gated_transformer_forward(x, params, *, heads, dim_head):
    B, N, D = x.shape
    depth = params["wqkv"].shape[0]
    mlp_dim = params["w2"].shape[1]
    hd = heads * dim_head
    R = B * N
    x2 = x.reshape(R, D).astype(jnp.float32)       # fold batch into rows

    kern = functools.partial(gated_transformer_kernel, batch=B, seq=N,
                             heads=heads, dim_head=dim_head, mlp_dim=mlp_dim)

    per_layer = ("attn_g", "attn_b", "wqkv", "wo", "bo",
                 "ff_g", "ff_b", "w1", "b1", "w2", "b2")
    operands = (x2,) + tuple(params[k] for k in per_layer) + (
        params["norm_g"], params["norm_b"])

    def const_spec(a):
        nd = a.ndim
        return pl.BlockSpec(a.shape, lambda l, nd=nd: (0,) * nd)

    def layer_spec(a):
        # One layer's slab per grid step; BlockSpec pipelining double-buffers it.
        nz = a.ndim - 1
        return pl.BlockSpec((1,) + a.shape[1:], lambda l, nz=nz: (l,) + (0,) * nz)

    in_specs = ([const_spec(x2)]
                + [layer_spec(params[k]) for k in per_layer]
                + [const_spec(params["norm_g"]), const_spec(params["norm_b"])])

    # Advisory cost estimate for the whole forward pass.
    mm_flops = depth * (2 * R * D * 3 * hd                        # fused QKV
                        + 2 * B * heads * N * N * dim_head * 2    # QK^T + PV
                        + 2 * R * hd * D                          # output projection
                        + 2 * R * D * 2 * mlp_dim                 # fused SwiGLU up-proj
                        + 2 * R * mlp_dim * D)                    # SwiGLU down-proj
    transcendentals = depth * (B * heads * N * N + R * mlp_dim)
    bytes_accessed = (sum(int(a.size) * a.dtype.itemsize for a in operands)
                      + R * D * 4)

    out = pl.pallas_call(
        kern,
        out_shape=jax.ShapeDtypeStruct((R, D), jnp.float32),
        grid=(depth,),                       # depth streamed; weights per-layer
        in_specs=in_specs,
        out_specs=pl.BlockSpec((R, D), lambda l: (0, 0)),
        scratch_shapes=[pltpu.VMEM((R, D), jnp.float32)],   # resident activation
        compiler_params=pltpu.CompilerParams(
            dimension_semantics=("arbitrary",),
            vmem_limit_bytes=32 * 1024 * 1024),
        cost_estimate=pl.CostEstimate(
            flops=int(mm_flops),
            transcendentals=int(transcendentals),
            bytes_accessed=int(bytes_accessed)),
    )(*operands)
    return out.reshape(B, N, D)


# -----------------------------------------------------------------------------
# Parameter init (matches GatedTransformer._init_weights):
#   Linear weight: trunc_normal(std=0.02), bias: 0; LayerNorm: weight=1, bias=0
# Weights stacked along a leading depth axis, stored (in, out)-major so kernels
# do x @ W.  Fused layouts:
#   wqkv: (depth, D, 3*H*dh)  [Q cols | K cols | V cols], softmax scale folded
#         into the Q columns.
#   wo  : (depth, H*dh, D)
#   w1  : (depth, D, 2*mlp)   [gate cols | value cols],  b1: (depth, 1, 2*mlp)
#   w2  : (depth, mlp, D)
# Matmul weights are bf16 (f32 master init); LN params / biases stay f32.
# -----------------------------------------------------------------------------
def init_gated_transformer(key, dim, depth, heads, dim_head, mlp_dim,
                           matmul_dtype=jnp.bfloat16):
    hd = heads * dim_head
    scale = dim_head ** -0.5

    def tn(k, shape):
        return jax.random.truncated_normal(k, -2.0, 2.0, shape, jnp.float32) * 0.02

    keys = jax.random.split(key, 4)
    wqkv = tn(keys[0], (depth, dim, 3 * hd))
    # Fold the attention softmax scale into the Q projection columns.
    wqkv = wqkv.at[:, :, :hd].multiply(scale)

    params = dict(
        attn_g=jnp.ones((depth, 1, dim), jnp.float32),
        attn_b=jnp.zeros((depth, 1, dim), jnp.float32),
        wqkv=wqkv.astype(matmul_dtype),
        wo=tn(keys[1], (depth, hd, dim)).astype(matmul_dtype),
        bo=jnp.zeros((depth, 1, dim), jnp.float32),
        ff_g=jnp.ones((depth, 1, dim), jnp.float32),
        ff_b=jnp.zeros((depth, 1, dim), jnp.float32),
        w1=tn(keys[2], (depth, dim, 2 * mlp_dim)).astype(matmul_dtype),
        b1=jnp.zeros((depth, 1, 2 * mlp_dim), jnp.float32),
        w2=tn(keys[3], (depth, mlp_dim, dim)).astype(matmul_dtype),
        b2=jnp.zeros((depth, 1, dim), jnp.float32),
        norm_g=jnp.ones((1, dim), jnp.float32),
        norm_b=jnp.zeros((1, dim), jnp.float32),
    )
    return params


if __name__ == "__main__":
    # Small shapes consistent with the module: (batch, seq, dim)
    B, N, DIM = 2, 16, 32
    DEPTH, HEADS, DIM_HEAD, MLP_DIM = 2, 4, 8, 64

    root = jax.random.PRNGKey(0)
    k_x, k_p = jax.random.split(root)
    x = jax.random.normal(k_x, (B, N, DIM), jnp.float32)

    params = init_gated_transformer(k_p, DIM, DEPTH, HEADS, DIM_HEAD, MLP_DIM)

    out = gated_transformer_forward(x, params, heads=HEADS, dim_head=DIM_HEAD)
    out = jax.block_until_ready(out)
    assert out.shape == (B, N, DIM)
    assert bool(jnp.all(jnp.isfinite(out)))
    print("KERNEL_OK")
</pallas_src>

<mosaic_0001>
module attributes {stable_mosaic.version = 11 : i64} {
  func.func @gated_transformer_kernel(%arg0: i32, %arg1: memref<32x32xf32, #tpu.memory_space<vmem>>, %arg2: memref<1x1x32xf32, #tpu.memory_space<vmem>>, %arg3: memref<1x1x32xf32, #tpu.memory_space<vmem>>, %arg4: memref<1x32x96xbf16, #tpu.memory_space<vmem>>, %arg5: memref<1x32x32xbf16, #tpu.memory_space<vmem>>, %arg6: memref<1x1x32xf32, #tpu.memory_space<vmem>>, %arg7: memref<1x1x32xf32, #tpu.memory_space<vmem>>, %arg8: memref<1x1x32xf32, #tpu.memory_space<vmem>>, %arg9: memref<1x32x128xbf16, #tpu.memory_space<vmem>>, %arg10: memref<1x1x128xf32, #tpu.memory_space<vmem>>, %arg11: memref<1x64x32xbf16, #tpu.memory_space<vmem>>, %arg12: memref<1x1x32xf32, #tpu.memory_space<vmem>>, %arg13: memref<1x32xf32, #tpu.memory_space<vmem>>, %arg14: memref<1x32xf32, #tpu.memory_space<vmem>>, %arg15: memref<32x32xf32, #tpu.memory_space<vmem>>, %arg16: memref<32x32xf32, #tpu.memory_space<vmem>>) attributes {dimension_semantics = [#tpu.dimension_semantics<arbitrary>], iteration_bounds = array<i64: 2>, scalar_prefetch = 0 : i64, scratch_operands = 1 : i64, tpu.core_type = #tpu.core_type<tc>, window_params = [{pipeline_mode = #tpu.pipeline_mode<synchronous>, transform_indices = @transform_0, window_bounds = array<i64: 32, 32>}, {transform_indices = @transform_1, window_bounds = array<i64: 1, 1, 32>}, {transform_indices = @transform_2, window_bounds = array<i64: 1, 1, 32>}, {transform_indices = @transform_3, window_bounds = array<i64: 1, 32, 96>}, {transform_indices = @transform_4, window_bounds = array<i64: 1, 32, 32>}, {transform_indices = @transform_5, window_bounds = array<i64: 1, 1, 32>}, {transform_indices = @transform_6, window_bounds = array<i64: 1, 1, 32>}, {transform_indices = @transform_7, window_bounds = array<i64: 1, 1, 32>}, {transform_indices = @transform_8, window_bounds = array<i64: 1, 32, 128>}, {transform_indices = @transform_9, window_bounds = array<i64: 1, 1, 128>}, {transform_indices = @transform_10, window_bounds = array<i64: 1, 64, 32>}, {transform_indices = @transform_11, window_bounds = array<i64: 1, 1, 32>}, {pipeline_mode = #tpu.pipeline_mode<synchronous>, transform_indices = @transform_12, window_bounds = array<i64: 1, 32>}, {pipeline_mode = #tpu.pipeline_mode<synchronous>, transform_indices = @transform_13, window_bounds = array<i64: 1, 32>}, {pipeline_mode = #tpu.pipeline_mode<synchronous>, transform_indices = @transform_14, window_bounds = array<i64: 32, 32>}]} {
    %c0_i32 = arith.constant 0 : i32
    %0 = arith.cmpi eq, %arg0, %c0_i32 : i32
    %1 = arith.extui %0 : i1 to i32
    %c0_i32_0 = arith.constant 0 : i32
    %2 = arith.cmpi ne, %1, %c0_i32_0 : i32
    scf.if %2 {
      %c0_68 = arith.constant 0 : index
      %c0_69 = arith.constant 0 : index
      %185 = vector.load %arg1[%c0_68, %c0_69] : memref<32x32xf32, #tpu.memory_space<vmem>>, vector<32x32xf32>
      %c0_70 = arith.constant 0 : index
      %c0_71 = arith.constant 0 : index
      %186 = vector.load %arg16[%c0_70, %c0_71] : memref<32x32xf32, #tpu.memory_space<vmem>>, vector<32x32xf32>
      tpu.vector_store %arg16[%c0_70, %c0_71], %185 {strides = array<i32>} : memref<32x32xf32, #tpu.memory_space<vmem>>, vector<32x32xf32>,
    } else {
    }
    %c0 = arith.constant 0 : index
    %c0_1 = arith.constant 0 : index
    %3 = vector.load %arg16[%c0, %c0_1] : memref<32x32xf32, #tpu.memory_space<vmem>>, vector<32x32xf32>
    %c0_2 = arith.constant 0 : index
    %c0_3 = arith.constant 0 : index
    %c0_4 = arith.constant 0 : index
    %4 = vector.load %arg2[%c0_2, %c0_3, %c0_4] : memref<1x1x32xf32, #tpu.memory_space<vmem>>, vector<1x1x32xf32>
    %5 = vector.shape_cast %4 : vector<1x1x32xf32> to vector<1x32xf32>
    %c0_5 = arith.constant 0 : index
    %c0_6 = arith.constant 0 : index
    %c0_7 = arith.constant 0 : index
    %6 = vector.load %arg3[%c0_5, %c0_6, %c0_7] : memref<1x1x32xf32, #tpu.memory_space<vmem>>, vector<1x1x32xf32>
    %7 = vector.shape_cast %6 : vector<1x1x32xf32> to vector<1x32xf32>
    %cst = arith.constant dense<0.000000e+00> : vector<32xf32>
    %8 = vector.multi_reduction <add>, %3, %cst [1] : vector<32x32xf32> to vector<32xf32>
    %9 = vector.shape_cast %8 : vector<32xf32> to vector<32x1xf32>
    %cst_8 = arith.constant 3.200000e+01 : f32
    %10 = vector.broadcast %cst_8 : f32 to vector<32x1xf32>
    %11 = arith.divf %9, %10 : vector<32x1xf32>
    %12 = vector.broadcast %11 : vector<32x1xf32> to vector<32x32xf32>
    %13 = arith.subf %3, %12 : vector<32x32xf32>
    %14 = arith.mulf %13, %13 : vector<32x32xf32>
    %cst_9 = arith.constant dense<0.000000e+00> : vector<32xf32>
    %15 = vector.multi_reduction <add>, %14, %cst_9 [1] : vector<32x32xf32> to vector<32xf32>
    %16 = vector.shape_cast %15 : vector<32xf32> to vector<32x1xf32>
    %cst_10 = arith.constant 3.200000e+01 : f32
    %17 = vector.broadcast %cst_10 : f32 to vector<32x1xf32>
    %18 = arith.divf %16, %17 : vector<32x1xf32>
    %cst_11 = arith.constant 9.99999974E-6 : f32
    %19 = vector.broadcast %cst_11 : f32 to vector<32x1xf32>
    %20 = arith.addf %18, %19 : vector<32x1xf32>
    %21 = math.rsqrt %20 : vector<32x1xf32>
    %22 = vector.broadcast %21 : vector<32x1xf32> to vector<32x32xf32>
    %23 = arith.mulf %13, %22 : vector<32x32xf32>
    %24 = vector.broadcast %5 : vector<1x32xf32> to vector<32x32xf32>
    %25 = arith.mulf %23, %24 : vector<32x32xf32>
    %26 = vector.broadcast %7 : vector<1x32xf32> to vector<32x32xf32>
    %27 = arith.addf %25, %26 : vector<32x32xf32>
    %28 = arith.truncf %27 : vector<32x32xf32> to vector<32x32xbf16>
    %c0_12 = arith.constant 0 : index
    %c0_13 = arith.constant 0 : index
    %c0_14 = arith.constant 0 : index
    %29 = vector.load %arg4[%c0_12, %c0_13, %c0_14] : memref<1x32x96xbf16, #tpu.memory_space<vmem>>, vector<1x32x96xbf16>
    %30 = vector.shape_cast %29 : vector<1x32x96xbf16> to vector<32x96xbf16>
    %cst_15 = arith.constant dense<0.000000e+00> : vector<32x96xf32>
    %31 = tpu.matmul %28, %30, %cst_15 {dimension_numbers = #tpu.dot_dimension_numbers<[1], [0], [0], [1], [0, 0, 1, 1], [], []>} : vector<32x32xbf16>, vector<32x96xbf16>, vector<32x96xf32> -> vector<32x96xf32>
    %32 = vector.extract_strided_slice %31 {offsets = [0, 0], sizes = [32, 8], strides = [1, 1]} : vector<32x96xf32> to vector<32x8xf32>
    %33 = vector.extract_strided_slice %31 {offsets = [0, 32], sizes = [32, 8], strides = [1, 1]} : vector<32x96xf32> to vector<32x8xf32>
    %34 = vector.extract_strided_slice %31 {offsets = [0, 64], sizes = [32, 8], strides = [1, 1]} : vector<32x96xf32> to vector<32x8xf32>
    %35 = vector.shape_cast %32 : vector<32x8xf32> to vector<2x16x8xf32>
    %36 = arith.truncf %35 : vector<2x16x8xf32> to vector<2x16x8xbf16>
    %37 = vector.shape_cast %33 : vector<32x8xf32> to vector<2x16x8xf32>
    %38 = arith.truncf %37 : vector<2x16x8xf32> to vector<2x16x8xbf16>
    %39 = vector.shape_cast %34 : vector<32x8xf32> to vector<2x16x8xf32>
    %40 = arith.truncf %39 : vector<2x16x8xf32> to vector<2x16x8xbf16>
    "tpu.trace_start"() <{level = 10 : i32, message = "bnd,bmd->bnm"}> : () -> ()
    %cst_16 = arith.constant dense<0.000000e+00> : vector<2x16x16xf32>
    %41 = tpu.matmul %36, %38, %cst_16 {dimension_numbers = #tpu.dot_dimension_numbers<[2], [2], [1], [1], [0, 0, 0, 1, 1, 1], [0], [0]>} : vector<2x16x8xbf16>, vector<2x16x8xbf16>, vector<2x16x16xf32> -> vector<2x16x16xf32>
    "tpu.trace_stop"() : () -> ()
    %cst_17 = arith.constant dense<0xFF800000> : vector<2x16xf32>
    %42 = vector.multi_reduction <maximumf>, %41, %cst_17 [2] : vector<2x16x16xf32> to vector<2x16xf32>
    %43 = vector.shape_cast %42 : vector<2x16xf32> to vector<2x16x1xf32>
    %44 = vector.broadcast %43 : vector<2x16x1xf32> to vector<2x16x16xf32>
    %45 = arith.subf %41, %44 : vector<2x16x16xf32>
    %46 = math.exp %45 : vector<2x16x16xf32>
    %cst_18 = arith.constant dense<0.000000e+00> : vector<2x16xf32>
    %47 = vector.multi_reduction <add>, %46, %cst_18 [2] : vector<2x16x16xf32> to vector<2x16xf32>
    %48 = vector.shape_cast %47 : vector<2x16xf32> to vector<2x16x1xf32>
    %49 = tpu.reciprocal %48 {approx = true} : vector<2x16x1xf32> -> vector<2x16x1xf32>
    %50 = vector.broadcast %49 : vector<2x16x1xf32> to vector<2x16x16xf32>
    %51 = arith.mulf %46, %50 : vector<2x16x16xf32>
    %52 = arith.truncf %51 : vector<2x16x16xf32> to vector<2x16x16xbf16>
    "tpu.trace_start"() <{level = 10 : i32, message = "bnm,bmd->bnd"}> : () -> ()
    %cst_19 = arith.constant dense<0.000000e+00> : vector<2x16x8xf32>
    %53 = tpu.matmul %52, %40, %cst_19 {dimension_numbers = #tpu.dot_dimension_numbers<[2], [1], [1], [2], [0, 0, 0, 1, 1, 2], [0], [0]>} : vector<2x16x16xbf16>, vector<2x16x8xbf16>, vector<2x16x8xf32> -> vector<2x16x8xf32>
    "tpu.trace_stop"() : () -> ()
    %54 = vector.extract_strided_slice %31 {offsets = [0, 8], sizes = [32, 8], strides = [1, 1]} : vector<32x96xf32> to vector<32x8xf32>
    %55 = vector.extract_strided_slice %31 {offsets = [0, 40], sizes = [32, 8], strides = [1, 1]} : vector<32x96xf32> to vector<32x8xf32>
    %56 = vector.extract_strided_slice %31 {offsets = [0, 72], sizes = [32, 8], strides = [1, 1]} : vector<32x96xf32> to vector<32x8xf32>
    %57 = vector.shape_cast %54 : vector<32x8xf32> to vector<2x16x8xf32>
    %58 = arith.truncf %57 : vector<2x16x8xf32> to vector<2x16x8xbf16>
    %59 = vector.shape_cast %55 : vector<32x8xf32> to vector<2x16x8xf32>
    %60 = arith.truncf %59 : vector<2x16x8xf32> to vector<2x16x8xbf16>
    %61 = vector.shape_cast %56 : vector<32x8xf32> to vector<2x16x8xf32>
    %62 = arith.truncf %61 : vector<2x16x8xf32> to vector<2x16x8xbf16>
    "tpu.trace_start"() <{level = 10 : i32, message = "bnd,bmd->bnm"}> : () -> ()
    %cst_20 = arith.constant dense<0.000000e+00> : vector<2x16x16xf32>
    %63 = tpu.matmul %58, %60, %cst_20 {dimension_numbers = #tpu.dot_dimension_numbers<[2], [2], [1], [1], [0, 0, 0, 1, 1, 1], [0], [0]>} : vector<2x16x8xbf16>, vector<2x16x8xbf16>, vector<2x16x16xf32> -> vector<2x16x16xf32>
    "tpu.trace_stop"() : () -> ()
    %cst_21 = arith.constant dense<0xFF800000> : vector<2x16xf32>
    %64 = vector.multi_reduction <maximumf>, %63, %cst_21 [2] : vector<2x16x16xf32> to vector<2x16xf32>
    %65 = vector.shape_cast %64 : vector<2x16xf32> to vector<2x16x1xf32>
    %66 = vector.broadcast %65 : vector<2x16x1xf32> to vector<2x16x16xf32>
    %67 = arith.subf %63, %66 : vector<2x16x16xf32>
    %68 = math.exp %67 : vector<2x16x16xf32>
    %cst_22 = arith.constant dense<0.000000e+00> : vector<2x16xf32>
    %69 = vector.multi_reduction <add>, %68, %cst_22 [2] : vector<2x16x16xf32> to vector<2x16xf32>
    %70 = vector.shape_cast %69 : vector<2x16xf32> to vector<2x16x1xf32>
    %71 = tpu.reciprocal %70 {approx = true} : vector<2x16x1xf32> -> vector<2x16x1xf32>
    %72 = vector.broadcast %71 : vector<2x16x1xf32> to vector<2x16x16xf32>
    %73 = arith.mulf %68, %72 : vector<2x16x16xf32>
    %74 = arith.truncf %73 : vector<2x16x16xf32> to vector<2x16x16xbf16>
    "tpu.trace_start"() <{level = 10 : i32, message = "bnm,bmd->bnd"}> : () -> ()
    %cst_23 = arith.constant dense<0.000000e+00> : vector<2x16x8xf32>
    %75 = tpu.matmul %74, %62, %cst_23 {dimension_numbers = #tpu.dot_dimension_numbers<[2], [1], [1], [2], [0, 0, 0, 1, 1, 2], [0], [0]>} : vector<2x16x16xbf16>, vector<2x16x8xbf16>, vector<2x16x8xf32> -> vector<2x16x8xf32>
    "tpu.trace_stop"() : () -> ()
    %76 = vector.extract_strided_slice %31 {offsets = [0, 16], sizes = [32, 8], strides = [1, 1]} : vector<32x96xf32> to vector<32x8xf32>
    %77 = vector.extract_strided_slice %31 {offsets = [0, 48], sizes = [32, 8], strides = [1, 1]} : vector<32x96xf32> to vector<32x8xf32>
    %78 = vector.extract_strided_slice %31 {offsets = [0, 80], sizes = [32, 8], strides = [1, 1]} : vector<32x96xf32> to vector<32x8xf32>
    %79 = vector.shape_cast %76 : vector<32x8xf32> to vector<2x16x8xf32>
    %80 = arith.truncf %79 : vector<2x16x8xf32> to vector<2x16x8xbf16>
    %81 = vector.shape_cast %77 : vector<32x8xf32> to vector<2x16x8xf32>
    %82 = arith.truncf %81 : vector<2x16x8xf32> to vector<2x16x8xbf16>
    %83 = vector.shape_cast %78 : vector<32x8xf32> to vector<2x16x8xf32>
    %84 = arith.truncf %83 : vector<2x16x8xf32> to vector<2x16x8xbf16>
    "tpu.trace_start"() <{level = 10 : i32, message = "bnd,bmd->bnm"}> : () -> ()
    %cst_24 = arith.constant dense<0.000000e+00> : vector<2x16x16xf32>
    %85 = tpu.matmul %80, %82, %cst_24 {dimension_numbers = #tpu.dot_dimension_numbers<[2], [2], [1], [1], [0, 0, 0, 1, 1, 1], [0], [0]>} : vector<2x16x8xbf16>, vector<2x16x8xbf16>, vector<2x16x16xf32> -> vector<2x16x16xf32>
    "tpu.trace_stop"() : () -> ()
    %cst_25 = arith.constant dense<0xFF800000> : vector<2x16xf32>
    %86 = vector.multi_reduction <maximumf>, %85, %cst_25 [2] : vector<2x16x16xf32> to vector<2x16xf32>
    %87 = vector.shape_cast %86 : vector<2x16xf32> to vector<2x16x1xf32>
    %88 = vector.broadcast %87 : vector<2x16x1xf32> to vector<2x16x16xf32>
    %89 = arith.subf %85, %88 : vector<2x16x16xf32>
    %90 = math.exp %89 : vector<2x16x16xf32>
    %cst_26 = arith.constant dense<0.000000e+00> : vector<2x16xf32>
    %91 = vector.multi_reduction <add>, %90, %cst_26 [2] : vector<2x16x16xf32> to vector<2x16xf32>
    %92 = vector.shape_cast %91 : vector<2x16xf32> to vector<2x16x1xf32>
    %93 = tpu.reciprocal %92 {approx = true} : vector<2x16x1xf32> -> vector<2x16x1xf32>
    %94 = vector.broadcast %93 : vector<2x16x1xf32> to vector<2x16x16xf32>
    %95 = arith.mulf %90, %94 : vector<2x16x16xf32>
    %96 = arith.truncf %95 : vector<2x16x16xf32> to vector<2x16x16xbf16>
    "tpu.trace_start"() <{level = 10 : i32, message = "bnm,bmd->bnd"}> : () -> ()
    %cst_27 = arith.constant dense<0.000000e+00> : vector<2x16x8xf32>
    %97 = tpu.matmul %96, %84, %cst_27 {dimension_numbers = #tpu.dot_dimension_numbers<[2], [1], [1], [2], [0, 0, 0, 1, 1, 2], [0], [0]>} : vector<2x16x16xbf16>, vector<2x16x8xbf16>, vector<2x16x8xf32> -> vector<2x16x8xf32>
    "tpu.trace_stop"() : () -> ()
    %98 = vector.extract_strided_slice %31 {offsets = [0, 24], sizes = [32, 8], strides = [1, 1]} : vector<32x96xf32> to vector<32x8xf32>
    %99 = vector.extract_strided_slice %31 {offsets = [0, 56], sizes = [32, 8], strides = [1, 1]} : vector<32x96xf32> to vector<32x8xf32>
    %100 = vector.extract_strided_slice %31 {offsets = [0, 88], sizes = [32, 8], strides = [1, 1]} : vector<32x96xf32> to vector<32x8xf32>
    %101 = vector.shape_cast %98 : vector<32x8xf32> to vector<2x16x8xf32>
    %102 = arith.truncf %101 : vector<2x16x8xf32> to vector<2x16x8xbf16>
    %103 = vector.shape_cast %99 : vector<32x8xf32> to vector<2x16x8xf32>
    %104 = arith.truncf %103 : vector<2x16x8xf32> to vector<2x16x8xbf16>
    %105 = vector.shape_cast %100 : vector<32x8xf32> to vector<2x16x8xf32>
    %106 = arith.truncf %105 : vector<2x16x8xf32> to vector<2x16x8xbf16>
    "tpu.trace_start"() <{level = 10 : i32, message = "bnd,bmd->bnm"}> : () -> ()
    %cst_28 = arith.constant dense<0.000000e+00> : vector<2x16x16xf32>
    %107 = tpu.matmul %102, %104, %cst_28 {dimension_numbers = #tpu.dot_dimension_numbers<[2], [2], [1], [1], [0, 0, 0, 1, 1, 1], [0], [0]>} : vector<2x16x8xbf16>, vector<2x16x8xbf16>, vector<2x16x16xf32> -> vector<2x16x16xf32>
    "tpu.trace_stop"() : () -> ()
    %cst_29 = arith.constant dense<0xFF800000> : vector<2x16xf32>
    %108 = vector.multi_reduction <maximumf>, %107, %cst_29 [2] : vector<2x16x16xf32> to vector<2x16xf32>
    %109 = vector.shape_cast %108 : vector<2x16xf32> to vector<2x16x1xf32>
    %110 = vector.broadcast %109 : vector<2x16x1xf32> to vector<2x16x16xf32>
    %111 = arith.subf %107, %110 : vector<2x16x16xf32>
    %112 = math.exp %111 : vector<2x16x16xf32>
    %cst_30 = arith.constant dense<0.000000e+00> : vector<2x16xf32>
    %113 = vector.multi_reduction <add>, %112, %cst_30 [2] : vector<2x16x16xf32> to vector<2x16xf32>
    %114 = vector.shape_cast %113 : vector<2x16xf32> to vector<2x16x1xf32>
    %115 = tpu.reciprocal %114 {approx = true} : vector<2x16x1xf32> -> vector<2x16x1xf32>
    %116 = vector.broadcast %115 : vector<2x16x1xf32> to vector<2x16x16xf32>
    %117 = arith.mulf %112, %116 : vector<2x16x16xf32>
    %118 = arith.truncf %117 : vector<2x16x16xf32> to vector<2x16x16xbf16>
    "tpu.trace_start"() <{level = 10 : i32, message = "bnm,bmd->bnd"}> : () -> ()
    %cst_31 = arith.constant dense<0.000000e+00> : vector<2x16x8xf32>
    %119 = tpu.matmul %118, %106, %cst_31 {dimension_numbers = #tpu.dot_dimension_numbers<[2], [1], [1], [2], [0, 0, 0, 1, 1, 2], [0], [0]>} : vector<2x16x16xbf16>, vector<2x16x8xbf16>, vector<2x16x8xf32> -> vector<2x16x8xf32>
    "tpu.trace_stop"() : () -> ()
    %120 = tpu.concatenate %53, %75, %97, %119 in 2 : vector<2x16x8xf32>, vector<2x16x8xf32>, vector<2x16x8xf32>, vector<2x16x8xf32> -> vector<2x16x32xf32>
    %121 = vector.shape_cast %120 : vector<2x16x32xf32> to vector<32x32xf32>
    %122 = arith.truncf %121 : vector<32x32xf32> to vector<32x32xbf16>
    %c0_32 = arith.constant 0 : index
    %c0_33 = arith.constant 0 : index
    %c0_34 = arith.constant 0 : index
    %123 = vector.load %arg5[%c0_32, %c0_33, %c0_34] : memref<1x32x32xbf16, #tpu.memory_space<vmem>>, vector<1x32x32xbf16>
    %124 = vector.shape_cast %123 : vector<1x32x32xbf16> to vector<32x32xbf16>
    %cst_35 = arith.constant dense<0.000000e+00> : vector<32x32xf32>
    %125 = tpu.matmul %122, %124, %cst_35 {dimension_numbers = #tpu.dot_dimension_numbers<[1], [0], [0], [1], [0, 0, 1, 1], [], []>} : vector<32x32xbf16>, vector<32x32xbf16>, vector<32x32xf32> -> vector<32x32xf32>
    %126 = arith.addf %3, %125 : vector<32x32xf32>
    %c0_36 = arith.constant 0 : index
    %c0_37 = arith.constant 0 : index
    %c0_38 = arith.constant 0 : index
    %127 = vector.load %arg6[%c0_36, %c0_37, %c0_38] : memref<1x1x32xf32, #tpu.memory_space<vmem>>, vector<1x1x32xf32>
    %128 = vector.shape_cast %127 : vector<1x1x32xf32> to vector<1x32xf32>
    %129 = vector.broadcast %128 : vector<1x32xf32> to vector<32x32xf32>
    %130 = arith.addf %126, %129 : vector<32x32xf32>
    %c0_39 = arith.constant 0 : index
    %c0_40 = arith.constant 0 : index
    %c0_41 = arith.constant 0 : index
    %131 = vector.load %arg7[%c0_39, %c0_40, %c0_41] : memref<1x1x32xf32, #tpu.memory_space<vmem>>, vector<1x1x32xf32>
    %132 = vector.shape_cast %131 : vector<1x1x32xf32> to vector<1x32xf32>
    %c0_42 = arith.constant 0 : index
    %c0_43 = arith.constant 0 : index
    %c0_44 = arith.constant 0 : index
    %133 = vector.load %arg8[%c0_42, %c0_43, %c0_44] : memref<1x1x32xf32, #tpu.memory_space<vmem>>, vector<1x1x32xf32>
    %134 = vector.shape_cast %133 : vector<1x1x32xf32> to vector<1x32xf32>
    %cst_45 = arith.constant dense<0.000000e+00> : vector<32xf32>
    %135 = vector.multi_reduction <add>, %130, %cst_45 [1] : vector<32x32xf32> to vector<32xf32>
    %136 = vector.shape_cast %135 : vector<32xf32> to vector<32x1xf32>
    %cst_46 = arith.constant 3.200000e+01 : f32
    %137 = vector.broadcast %cst_46 : f32 to vector<32x1xf32>
    %138 = arith.divf %136, %137 : vector<32x1xf32>
    %139 = vector.broadcast %138 : vector<32x1xf32> to vector<32x32xf32>
    %140 = arith.subf %130, %139 : vector<32x32xf32>
    %141 = arith.mulf %140, %140 : vector<32x32xf32>
    %cst_47 = arith.constant dense<0.000000e+00> : vector<32xf32>
    %142 = vector.multi_reduction <add>, %141, %cst_47 [1] : vector<32x32xf32> to vector<32xf32>
    %143 = vector.shape_cast %142 : vector<32xf32> to vector<32x1xf32>
    %cst_48 = arith.constant 3.200000e+01 : f32
    %144 = vector.broadcast %cst_48 : f32 to vector<32x1xf32>
    %145 = arith.divf %143, %144 : vector<32x1xf32>
    %cst_49 = arith.constant 9.99999974E-6 : f32
    %146 = vector.broadcast %cst_49 : f32 to vector<32x1xf32>
    %147 = arith.addf %145, %146 : vector<32x1xf32>
    %148 = math.rsqrt %147 : vector<32x1xf32>
    %149 = vector.broadcast %148 : vector<32x1xf32> to vector<32x32xf32>
    %150 = arith.mulf %140, %149 : vector<32x32xf32>
    %151 = vector.broadcast %132 : vector<1x32xf32> to vector<32x32xf32>
    %152 = arith.mulf %150, %151 : vector<32x32xf32>
    %153 = vector.broadcast %134 : vector<1x32xf32> to vector<32x32xf32>
    %154 = arith.addf %152, %153 : vector<32x32xf32>
    %155 = arith.truncf %154 : vector<32x32xf32> to vector<32x32xbf16>
    %c0_50 = arith.constant 0 : index
    %c0_51 = arith.constant 0 : index
    %c0_52 = arith.constant 0 : index
    %156 = vector.load %arg9[%c0_50, %c0_51, %c0_52] : memref<1x32x128xbf16, #tpu.memory_space<vmem>>, vector<1x32x128xbf16>
    %157 = vector.shape_cast %156 : vector<1x32x128xbf16> to vector<32x128xbf16>
    %cst_53 = arith.constant dense<0.000000e+00> : vector<32x128xf32>
    %158 = tpu.matmul %155, %157, %cst_53 {dimension_numbers = #tpu.dot_dimension_numbers<[1], [0], [0], [1], [0, 0, 1, 1], [], []>} : vector<32x32xbf16>, vector<32x128xbf16>, vector<32x128xf32> -> vector<32x128xf32>
    %c0_54 = arith.constant 0 : index
    %c0_55 = arith.constant 0 : index
    %c0_56 = arith.constant 0 : index
    %159 = vector.load %arg10[%c0_54, %c0_55, %c0_56] : memref<1x1x128xf32, #tpu.memory_space<vmem>>, vector<1x1x128xf32>
    %160 = vector.shape_cast %159 : vector<1x1x128xf32> to vector<1x128xf32>
    %161 = vector.broadcast %160 : vector<1x128xf32> to vector<32x128xf32>
    %162 = arith.addf %158, %161 : vector<32x128xf32>
    %163 = vector.extract_strided_slice %162 {offsets = [0, 0], sizes = [32, 64], strides = [1, 1]} : vector<32x128xf32> to vector<32x64xf32>
    %164 = vector.extract_strided_slice %162 {offsets = [0, 64], sizes = [32, 64], strides = [1, 1]} : vector<32x128xf32> to vector<32x64xf32>
    %165 = arith.negf %163 : vector<32x64xf32>
    %166 = math.exp %165 : vector<32x64xf32>
    %cst_57 = arith.constant 1.000000e+00 : f32
    %167 = vector.broadcast %cst_57 : f32 to vector<32x64xf32>
    %168 = arith.addf %167, %166 : vector<32x64xf32>
    %169 = arith.divf %167, %168 : vector<32x64xf32>
    %170 = arith.mulf %163, %169 : vector<32x64xf32>
    %171 = arith.mulf %170, %164 : vector<32x64xf32>
    %172 = arith.truncf %171 : vector<32x64xf32> to vector<32x64xbf16>
    %c0_58 = arith.constant 0 : index
    %c0_59 = arith.constant 0 : index
    %c0_60 = arith.constant 0 : index
    %173 = vector.load %arg11[%c0_58, %c0_59, %c0_60] : memref<1x64x32xbf16, #tpu.memory_space<vmem>>, vector<1x64x32xbf16>
    %174 = vector.shape_cast %173 : vector<1x64x32xbf16> to vector<64x32xbf16>
    %cst_61 = arith.constant dense<0.000000e+00> : vector<32x32xf32>
    %175 = tpu.matmul %172, %174, %cst_61 {dimension_numbers = #tpu.dot_dimension_numbers<[1], [0], [0], [1], [0, 0, 1, 1], [], []>} : vector<32x64xbf16>, vector<64x32xbf16>, vector<32x32xf32> -> vector<32x32xf32>
    %176 = arith.addf %130, %175 : vector<32x32xf32>
    %c0_62 = arith.constant 0 : index
    %c0_63 = arith.constant 0 : index
    %c0_64 = arith.constant 0 : index
    %177 = vector.load %arg12[%c0_62, %c0_63, %c0_64] : memref<1x1x32xf32, #tpu.memory_space<vmem>>, vector<1x1x32xf32>
    %178 = vector.shape_cast %177 : vector<1x1x32xf32> to vector<1x32xf32>
    %179 = vector.broadcast %178 : vector<1x32xf32> to vector<32x32xf32>
    %180 = arith.addf %176, %179 : vector<32x32xf32>
    %c0_65 = arith.constant 0 : index
    %c0_66 = arith.constant 0 : index
    %181 = vector.load %arg16[%c0_65, %c0_66] : memref<32x32xf32, #tpu.memory_space<vmem>>, vector<32x32xf32>
    tpu.vector_store %arg16[%c0_65, %c0_66], %180 {strides = array<i32>} : memref<32x32xf32, #tpu.memory_space<vmem>>, vector<32x32xf32>,
    %c1_i32 = arith.constant 1 : i32
    %182 = arith.cmpi eq, %arg0, %c1_i32 : i32
    %183 = arith.extui %182 : i1 to i32
    %c0_i32_67 = arith.constant 0 : i32
    %184 = arith.cmpi ne, %183, %c0_i32_67 : i32
    scf.if %184 {
      %c0_68 = arith.constant 0 : index
      %c0_69 = arith.constant 0 : index
      %185 = vector.load %arg13[%c0_68, %c0_69] : memref<1x32xf32, #tpu.memory_space<vmem>>, vector<1x32xf32>
      %c0_70 = arith.constant 0 : index
      %c0_71 = arith.constant 0 : index
      %186 = vector.load %arg14[%c0_70, %c0_71] : memref<1x32xf32, #tpu.memory_space<vmem>>, vector<1x32xf32>
      %cst_72 = arith.constant dense<0.000000e+00> : vector<32xf32>
      %187 = vector.multi_reduction <add>, %180, %cst_72 [1] : vector<32x32xf32> to vector<32xf32>
      %188 = vector.shape_cast %187 : vector<32xf32> to vector<32x1xf32>
      %cst_73 = arith.constant 3.200000e+01 : f32
      %189 = vector.broadcast %cst_73 : f32 to vector<32x1xf32>
      %190 = arith.divf %188, %189 : vector<32x1xf32>
      %191 = vector.broadcast %190 : vector<32x1xf32> to vector<32x32xf32>
      %192 = arith.subf %180, %191 : vector<32x32xf32>
      %193 = arith.mulf %192, %192 : vector<32x32xf32>
      %cst_74 = arith.constant dense<0.000000e+00> : vector<32xf32>
      %194 = vector.multi_reduction <add>, %193, %cst_74 [1] : vector<32x32xf32> to vector<32xf32>
      %195 = vector.shape_cast %194 : vector<32xf32> to vector<32x1xf32>
      %cst_75 = arith.constant 3.200000e+01 : f32
      %196 = vector.broadcast %cst_75 : f32 to vector<32x1xf32>
      %197 = arith.divf %195, %196 : vector<32x1xf32>
      %cst_76 = arith.constant 9.99999974E-6 : f32
      %198 = vector.broadcast %cst_76 : f32 to vector<32x1xf32>
      %199 = arith.addf %197, %198 : vector<32x1xf32>
      %200 = math.rsqrt %199 : vector<32x1xf32>
      %201 = vector.broadcast %200 : vector<32x1xf32> to vector<32x32xf32>
      %202 = arith.mulf %192, %201 : vector<32x32xf32>
      %203 = vector.broadcast %185 : vector<1x32xf32> to vector<32x32xf32>
      %204 = arith.mulf %202, %203 : vector<32x32xf32>
      %205 = vector.broadcast %186 : vector<1x32xf32> to vector<32x32xf32>
      %206 = arith.addf %204, %205 : vector<32x32xf32>
      %c0_77 = arith.constant 0 : index
      %c0_78 = arith.constant 0 : index
      %207 = vector.load %arg15[%c0_77, %c0_78] : memref<32x32xf32, #tpu.memory_space<vmem>>, vector<32x32xf32>
      tpu.vector_store %arg15[%c0_77, %c0_78], %206 {strides = array<i32>} : memref<32x32xf32, #tpu.memory_space<vmem>>, vector<32x32xf32>,
    } else {
    }
    return
  }
  func.func @transform_0(%arg0: i32) -> (i32, i32) {
    %c0_i32 = arith.constant 0 : i32
    %c0_i32_0 = arith.constant 0 : i32
    %c0_i32_1 = arith.constant 0 : i32
    return %c0_i32, %c0_i32_0 : i32, i32
  }
  func.func @transform_1(%arg0: i32) -> (i32, i32, i32) {
    %c0_i32 = arith.constant 0 : i32
    %c0_i32_0 = arith.constant 0 : i32
    %c0_i32_1 = arith.constant 0 : i32
    return %arg0, %c0_i32, %c0_i32_0 : i32, i32, i32
  }
  func.func @transform_2(%arg0: i32) -> (i32, i32, i32) {
    %c0_i32 = arith.constant 0 : i32
    %c0_i32_0 = arith.constant 0 : i32
    %c0_i32_1 = arith.constant 0 : i32
    return %arg0, %c0_i32, %c0_i32_0 : i32, i32, i32
  }
  func.func @transform_3(%arg0: i32) -> (i32, i32, i32) {
    %c0_i32 = arith.constant 0 : i32
    %c0_i32_0 = arith.constant 0 : i32
    %c0_i32_1 = arith.constant 0 : i32
    return %arg0, %c0_i32, %c0_i32_0 : i32, i32, i32
  }
  func.func @transform_4(%arg0: i32) -> (i32, i32, i32) {
    %c0_i32 = arith.constant 0 : i32
    %c0_i32_0 = arith.constant 0 : i32
    %c0_i32_1 = arith.constant 0 : i32
    return %arg0, %c0_i32, %c0_i32_0 : i32, i32, i32
  }
  func.func @transform_5(%arg0: i32) -> (i32, i32, i32) {
    %c0_i32 = arith.constant 0 : i32
    %c0_i32_0 = arith.constant 0 : i32
    %c0_i32_1 = arith.constant 0 : i32
    return %arg0, %c0_i32, %c0_i32_0 : i32, i32, i32
  }
  func.func @transform_6(%arg0: i32) -> (i32, i32, i32) {
    %c0_i32 = arith.constant 0 : i32
    %c0_i32_0 = arith.constant 0 : i32
    %c0_i32_1 = arith.constant 0 : i32
    return %arg0, %c0_i32, %c0_i32_0 : i32, i32, i32
  }
  func.func @transform_7(%arg0: i32) -> (i32, i32, i32) {
    %c0_i32 = arith.constant 0 : i32
    %c0_i32_0 = arith.constant 0 : i32
    %c0_i32_1 = arith.constant 0 : i32
    return %arg0, %c0_i32, %c0_i32_0 : i32, i32, i32
  }
  func.func @transform_8(%arg0: i32) -> (i32, i32, i32) {
    %c0_i32 = arith.constant 0 : i32
    %c0_i32_0 = arith.constant 0 : i32
    %c0_i32_1 = arith.constant 0 : i32
    return %arg0, %c0_i32, %c0_i32_0 : i32, i32, i32
  }
  func.func @transform_9(%arg0: i32) -> (i32, i32, i32) {
    %c0_i32 = arith.constant 0 : i32
    %c0_i32_0 = arith.constant 0 : i32
    %c0_i32_1 = arith.constant 0 : i32
    return %arg0, %c0_i32, %c0_i32_0 : i32, i32, i32
  }
  func.func @transform_10(%arg0: i32) -> (i32, i32, i32) {
    %c0_i32 = arith.constant 0 : i32
    %c0_i32_0 = arith.constant 0 : i32
    %c0_i32_1 = arith.constant 0 : i32
    return %arg0, %c0_i32, %c0_i32_0 : i32, i32, i32
  }
  func.func @transform_11(%arg0: i32) -> (i32, i32, i32) {
    %c0_i32 = arith.constant 0 : i32
    %c0_i32_0 = arith.constant 0 : i32
    %c0_i32_1 = arith.constant 0 : i32
    return %arg0, %c0_i32, %c0_i32_0 : i32, i32, i32
  }
  func.func @transform_12(%arg0: i32) -> (i32, i32) {
    %c0_i32 = arith.constant 0 : i32
    %c0_i32_0 = arith.constant 0 : i32
    %c0_i32_1 = arith.constant 0 : i32
    return %c0_i32, %c0_i32_0 : i32, i32
  }
  func.func @transform_13(%arg0: i32) -> (i32, i32) {
    %c0_i32 = arith.constant 0 : i32
    %c0_i32_0 = arith.constant 0 : i32
    %c0_i32_1 = arith.constant 0 : i32
    return %c0_i32, %c0_i32_0 : i32, i32
  }
  func.func @transform_14(%arg0: i32) -> (i32, i32) {
    %c0_i32 = arith.constant 0 : i32
    %c0_i32_0 = arith.constant 0 : i32
    %c0_i32_1 = arith.constant 0 : i32
    return %c0_i32, %c0_i32_0 : i32, i32
  }
}

</mosaic_0001>

<bundles_post_ra>
// kernel: tpu_custom_call.1
= control target key start
LH: loop header
LB: loop body
LE: loop exit
PB: predicated region body
PF: predicated region fallthrough
CT: control target
= control target key end

     0   :  { %s4008_s0 = inlined_call_operand.vmem [shape: f32[32,32], index: 0, kind: input, shape index: {}]   ;;  %s4009_s1 = inlined_call_operand.vmem [shape: f32[2,1,32], index: 1, kind: input, shape index: {}]   ;;  %s4010_s2 = inlined_call_operand.vmem [shape: f32[2,1,32], index: 2, kind: input, shape index: {}]   ;;  %s4011_s3 = inlined_call_operand.vmem [shape: bf16[2,32,96], index: 3, kind: input, shape index: {}]   ;;  %s4012_s4 = inlined_call_operand.vmem [shape: bf16[2,32,32], index: 4, kind: input, shape index: {}]   ;;  %s4013_s5 = inlined_call_operand.hbm [shape: f32[2,1,32], index: 5, kind: input, shape index: {}]   ;;  %s4014_s6 = inlined_call_operand.hbm [shape: f32[2,1,32], index: 6, kind: input, shape index: {}]   ;;  %s4015_s7 = inlined_call_operand.hbm [shape: f32[2,1,32], index: 7, kind: input, shape index: {}]   ;;  %s4016_s8 = inlined_call_operand.hbm [shape: bf16[2,32,128], index: 8, kind: input, shape index: {}]   ;;  %s4017_s9 = inlined_call_operand.hbm [shape: f32[2,1,128], index: 9, kind: input, shape index: {}]   ;;  %s4018_s10 = inlined_call_operand.vmem [shape: bf16[2,64,32], index: 10, kind: input, shape index: {}]   ;;  %s4019_s11 = inlined_call_operand.vmem [shape: f32[2,1,32], index: 11, kind: input, shape index: {}]   ;;  %s4020_s12 = inlined_call_operand.vmem [shape: f32[1,32], index: 12, kind: input, shape index: {}]   ;;  %s4021_s13 = inlined_call_operand.vmem [shape: f32[1,32], index: 13, kind: input, shape index: {}]   ;;  %s4022_s14 = inlined_call_operand.hbm [shape: f32[32,32], index: 14, kind: output, shape index: {}]  }
   0x1   :  { %4032 = sst [smem:[#allocation20_spill]] %s4008_s0 }
   0x2   :  { %4033 = sst [smem:[#allocation21_spill]] %s4013_s5 }
   0x3   :  { %4034 = sst [smem:[#allocation22_spill]] %s4014_s6 }
   0x4   :  { %4035 = sst [smem:[#allocation23_spill]] %s4016_s8 }
   0x5   :  { %4036 = sst [smem:[#allocation24_spill]] %s4018_s10 }
   0x6   :  { %4037 = sst [smem:[#allocation25_spill]] %s4019_s11 }
   0x7   :  { %4038 = sst [smem:[#allocation26_spill]] %s4020_s12 }
   0x8   :  { %4039 = sst [smem:[#allocation27_spill]] %s4021_s13 }
   0x9   :  { %4040 = sst [smem:[#allocation28_spill]] %s4022_s14 }
   0xa   :  { %19 = vsyncpa [#allocation4], 0 }
   0xb   :  { %21 = vsyncpa [#allocation4 + $0x1], 0 }
   0xc   :  { %22 = vsyncpa [#allocation7], 0 }
   0xd   :  { %24 = vsyncpa [#allocation7 + $0x1], 0 }
   0xe   :  { %25 = vsyncpa [#allocation10], 0 }
   0xf   :  { %27 = vsyncpa [#allocation10 + $0x1], 0 }
  0x10   :  { %28 = vsyncpa [#allocation5], 0  ;;  %s3395_s29 = smov 0   ;;  %s3397_s30 = smov 0  }
  0x11   :  { %s3399_s15 = smov 0   ;;  %s3401_s16 = smov 0  }
  0x12 LB: > { %4041 = sst [smem:[#allocation17_spill]] %s3289_s15  ;;  %s3414_s17 = sadd.s32 4294967295, %s3293_s16   ;;  %s3293_s16 = sphi %s3401_s16, %s4066_s16   ;;  %s3289_s15 = sphi %s3399_s15, %s4068_s15   ;;  %s3285_s30 = sphi %s3397_s30, %s4070_s30   ;;  %s3281_s29 = sphi %s3395_s29, %s4069_s29  }
  0x13   : > { %s3417_s18 = sadd.s32 1, %s3293_s16   ;;  %s166_s20 = sadd.s32 1, %s3289_s15 }
  0x14   : > { %4042 = sst [smem:[#allocation18_spill]] %s3417_s18  ;;  %s163_s19 = ssub.s32 %s3293_s16, %s3417_s18 }
  0x15   : > { %p164_p0 = scmp.eq.s32.totalorder %s163_s19, 0  ;;  %p173_p1 = scmp.ne.s32.totalorder %s3289_s15, %s3285_s30 }
  0x16   : > { %p174_p2 = scmp.eq.s32.totalorder %s3293_s16, 0  ;;  %p179_p3 = scmp.ne.s32.totalorder %s3285_s30, %s3281_s29 }
  0x17   : > { %s3427_s21 = scalar_select %p164_p0, %s3289_s15, %s166_s20  }
  0x18   : > { %p175_p4 = por %p174_p2, %p173_p1  ;;  %p180_p5 = scmp.eq.s32.totalorder %s3414_s17, 0 }
  0x19   : > { %4043 = sst [smem:[#allocation19_spill]] %s3427_s21  ;;  %p2868_p6 = scmp.lt.s32.totalorder %s3293_s16, 2 }
  0x1a   : > { %p3431_p7 = por %p180_p5, %p179_p3  ;;  %s3436_s23 = sand.u32 1, %s3289_s15  }
  0x1b   : > { %s3439_s24 = sshll.u32 %s3293_s16, 4  ;;  %p3441_p8 = pnand %p2868_p6, %p175_p4 }
  0x1c   : > { %s4044_s22 = scalar_select %p3431_p7, 1, 0 }
  0x1d   : > { %s4045_s25 = scalar_select %p3441_p8, 1, 0 }
  0x1e   : > { %s4027_s26 = sand.u32 1, %s3293_s16   ;;  %s4046_s6 = sld [smem:[#allocation22_spill]] }
  0x1f   : > { %s479_s19 = scalar_lea.vmem [#allocation6], %s3436_s23  ;;  %s3457_s21 = scalar_lea.sflag [#allocation7], %s4027_s26 }
  0x20   : > { %s486_s20 = sshll.u32 %s479_s19, 4  ;;  %p3463_p10 = pneg %p3441_p8  ;;  %s3453_s20 = int_to_ptr.vmem [resolvable:$true] %s486_s20 }
  0x24   : > { %s3450_s29 = scalar_lea.hbm %s4046_s6, %s3439_s24  ;;  %s3076_s19 = scalar_lea.hbm %s4046_s6, 32 }
  0x25   : > { %s3071_s15 = scalar_lea.hbm %s3450_s29, 16  ;;  %p3077_p13 = scmp.lt.u32.totalorder %s3450_s29, %s4046_s6 }
  0x26   : > { %p3072_p9 = scmp.ne.s32.totalorder %s3450_s29, %s3071_s15  ;;  %p3078_p0 = scmp.lt.u32.totalorder %s3076_s19, %s3071_s15 }
  0x27   : > { %p3080_p2 = scmp.lt.u32.totalorder %s3071_s15, %s3450_s29 }
  0x28   : > { %p3074_p11 = pnand %p3463_p10, %p3072_p9  ;;  %p3079_p1 = por %p3078_p0, %p3077_p13 }
  0x2a   : > { %p3075_p12 = pneg %p3074_p11  ;;  %p3081_p3 = por %p3080_p2, %p3079_p1 }
  0x2c   : > { %p3082_p4 = pnand %p3081_p3, %p3075_p12 }
  0x2e   : > { %3085 = shalt.err (!%p3082_p4)
}
  0x2f   : > { %s3086_s26 = scalar_lea.vmem %s3453_s20, 16  ;;  %s3295_s27 = smov [#allocation6]  }
  0x30   : > { %p3087_p5 = scmp.ne.s32.totalorder %s3453_s20, %s3086_s26  ;;  %s3091_s28 = sshll.u32 %s3295_s27, 4  ;;  %s3092_s28 = int_to_ptr.vmem [resolvable:$false] %s3091_s28 }
  0x31   : > { %s3093_s13 = scalar_lea.vmem %s3092_s28, 32  ;;  %p3094_p11 = scmp.lt.s32.totalorder %s3453_s20, %s3092_s28 }
  0x32   : > { %p3089_p6 = pnand %p3087_p5, %p3463_p10  ;;  %p3095_p7 = scmp.lt.s32.totalorder %s3093_s13, %s3086_s26 }
  0x34   : > { %p3090_p9 = pneg %p3089_p6  ;;  %p3096_p13 = por %p3095_p7, %p3094_p11 }
  0x36   : > { %p3097_p0 = pnand %p3096_p13, %p3090_p9 }
  0x38   : > { %3100 = shalt.err (!%p3097_p0)
}
  0x39   : > { %2858 = dma.hbm_to_vmem [thread:$0]  (!%p3441_p8), %s3450_s29, 16, %s3453_s20, %s3457_s21  }
  0x3a   : > { %p2591_p12 = scmp.ge.s32.totalorder %s3293_s16, 1  ;;  %p560_p1 = scmp.lt.s32.totalorder %s3293_s16, 3 }
  0x3b   : > { %s2587_s14 = sshll.u32 %s3436_s23, 4  ;;  %s2652_s15 = sshll.u32 %s3293_s16, 8 }
  0x3c   : > { %p3491_p2 = pnand %p2591_p12, %p560_p1  ;;  %s4049_s8 = sld [smem:[#allocation23_spill]] }
  0x3d   : > { %s514_s13 = scalar_lea.vmem [#allocation9], %s2587_s14  ;;  %s4050_s29 = sand.u32 1, %s3293_s16  }
  0x3e   : > { %s4048_s26 = scalar_select %p3491_p2, 1, 0 }
  0x3f   : > { %s521_s6 = sshll.u32 %s514_s13, 4  ;;  %s3504_s20 = scalar_lea.sflag [#allocation10], %s4050_s29  ;;  %s3500_s6 = int_to_ptr.vmem [resolvable:$true] %s521_s6 }
  0x42   : > { %s3498_s28 = scalar_lea.hbm %s4049_s8, %s2652_s15  ;;  %s3106_s15 = scalar_lea.hbm %s4049_s8, 512 }
  0x43   : > { %s3101_s12 = scalar_lea.hbm %s3498_s28, 256  ;;  %p3107_p5 = scmp.lt.u32.totalorder %s3498_s28, %s4049_s8 }
  0x44   : > { %p3102_p7 = scmp.ne.s32.totalorder %s3498_s28, %s3101_s12  ;;  %p3108_p6 = scmp.lt.u32.totalorder %s3106_s15, %s3101_s12 }
  0x45   : > { %p3110_p11 = scmp.lt.u32.totalorder %s3101_s12, %s3498_s28 }
  0x46   : > { %p3104_p3 = pnand %p3102_p7, %p3463_p10  ;;  %p3109_p9 = por %p3108_p6, %p3107_p5 }
  0x48   : > { %p3105_p4 = pneg %p3104_p3  ;;  %p3111_p13 = por %p3110_p11, %p3109_p9 }
  0x4a   : > { %p3112_p0 = pnand %p3111_p13, %p3105_p4 }
  0x4c   : > { %3115 = shalt.err (!%p3112_p0)
}
  0x4d   : > { %s3116_s16 = scalar_lea.vmem %s3500_s6, 256  ;;  %s3296_s0 = smov [#allocation9]  }
  0x4e   : > { %p3117_p12 = scmp.ne.s32.totalorder %s3500_s6, %s3116_s16  ;;  %s3121_s14 = sshll.u32 %s3296_s0, 4  ;;  %s3122_s14 = int_to_ptr.vmem [resolvable:$false] %s3121_s14 }
  0x4f   : > { %s3123_s11 = scalar_lea.vmem %s3122_s14, 512  ;;  %p3124_p3 = scmp.lt.s32.totalorder %s3500_s6, %s3122_s14 }
  0x50   : > { %p3119_p1 = pnand %p3117_p12, %p3463_p10  ;;  %p3125_p2 = scmp.lt.s32.totalorder %s3123_s11, %s3116_s16 }
  0x52   : > { %p3120_p7 = pneg %p3119_p1  ;;  %p3126_p5 = por %p3125_p2, %p3124_p3 }
  0x54   : > { %p3127_p6 = pnand %p3126_p5, %p3120_p7 }
  0x56   : > { %3130 = shalt.err (!%p3127_p6)
}
  0x57   : > { %s3297_s12 = smov 64   ;;  %s3298_s13 = smov 4  }
  0x58   : > { %2864 = dma.hbm_to_vmem [thread:$0]  (!%p3441_p8), %s3498_s28, 256, %s3500_s6, %s3504_s20, %s3297_s12, %s3297_s12, %s3298_s13  }
  0x59   : > { %s4051_s5 = sld [smem:[#allocation21_spill]]  ;;  %s462_s27 = scalar_lea.vmem [#allocation3], %s3436_s23 }
  0x5a   : > { %s469_s16 = sshll.u32 %s462_s27, 4  ;;  %s3541_s11 = scalar_lea.hbm %s4015_s7, %s3439_s24  ;;  %s3535_s16 = int_to_ptr.vmem [resolvable:$true] %s469_s16 }
  0x5b   : > { %s460_s8 = scalar_lea.sflag [#allocation4], %s3436_s23 }
  0x5f   : > { %s3532_s15 = scalar_lea.hbm %s4051_s5, %s3439_s24  ;;  %s3136_s13 = scalar_lea.hbm %s4051_s5, 32 }
  0x60   : > { %s3131_s6 = scalar_lea.hbm %s3532_s15, 16  ;;  %p3137_p11 = scmp.lt.u32.totalorder %s3532_s15, %s4051_s5 }
  0x61   : > { %p3132_p2 = scmp.ne.s32.totalorder %s3532_s15, %s3131_s6  ;;  %p3138_p13 = scmp.lt.u32.totalorder %s3136_s13, %s3131_s6 }
  0x62   : > { %p3140_p12 = scmp.lt.u32.totalorder %s3131_s6, %s3532_s15 }
  0x63   : > { %p3134_p4 = pnand %p3132_p2, %p3463_p10  ;;  %p3139_p0 = por %p3138_p13, %p3137_p11 }
  0x65   : > { %p3135_p9 = pneg %p3134_p4  ;;  %p3141_p1 = por %p3140_p12, %p3139_p0 }
  0x67   : > { %p3142_p7 = pnand %p3141_p1, %p3135_p9 }
  0x69   : > { %3145 = shalt.err (!%p3142_p7)
}
  0x6a   : > { %s3146_s27 = scalar_lea.vmem %s3535_s16, 16  ;;  %s3299_s0 = smov [#allocation3]  }
  0x6b   : > { %p3147_p3 = scmp.ne.s32.totalorder %s3535_s16, %s3146_s27  ;;  %s3151_s14 = sshll.u32 %s3299_s0, 4  ;;  %s3152_s14 = int_to_ptr.vmem [resolvable:$false] %s3151_s14 }
  0x6c   : > { %s3153_s28 = scalar_lea.vmem %s3152_s14, 32  ;;  %p3154_p2 = scmp.lt.s32.totalorder %s3535_s16, %s3152_s14 }
  0x6d   : > { %p3149_p5 = pnand %p3147_p3, %p3463_p10  ;;  %p3155_p4 = scmp.lt.s32.totalorder %s3153_s28, %s3146_s27 }
  0x6f   : > { %p3150_p6 = pneg %p3149_p5  ;;  %p3156_p11 = por %p3155_p4, %p3154_p2 }
  0x71   : > { %p3157_p13 = pnand %p3156_p11, %p3150_p6 }
  0x73   : > { %3160 = shalt.err (!%p3157_p13)
}
  0x74   : > { %2855 = dma.hbm_to_vmem [thread:$0]  (!%p3441_p8), %s3532_s15, 16, %s3535_s16, %s460_s8  }
  0x75   : > { %s496_s6 = scalar_lea.vmem [#allocation8], %s3436_s23  ;;  %s3570_s19 = scalar_lea.hbm %s4017_s9, %s3439_s24 }
  0x76   : > { %s503_s12 = sshll.u32 %s496_s6, 4  ;;  %s3161_s27 = scalar_lea.hbm %s3541_s11, 16  ;;  %s504_s12 = int_to_ptr.vmem [resolvable:$true] %s503_s12 }
  0x77   : > { %p3162_p9 = scmp.ne.s32.totalorder %s3541_s11, %s3161_s27  ;;  %s3166_s28 = scalar_lea.hbm %s4015_s7, 32 }
  0x78   : > { %p3167_p1 = scmp.lt.u32.totalorder %s3541_s11, %s4015_s7  ;;  %p3168_p7 = scmp.lt.u32.totalorder %s3166_s28, %s3161_s27 }
  0x79   : > { %p3164_p0 = pnand %p3162_p9, %p3463_p10  ;;  %p3170_p5 = scmp.lt.u32.totalorder %s3161_s27, %s3541_s11 }
  0x7a   : > { %p3169_p3 = por %p3168_p7, %p3167_p1 }
  0x7b   : > { %p3165_p12 = pneg %p3164_p0 }
  0x7c   : > { %p3171_p6 = por %p3170_p5, %p3169_p3 }
  0x7e   : > { %p3172_p2 = pnand %p3171_p6, %p3165_p12 }
  0x80   : > { %3175 = shalt.err (!%p3172_p2)
}
  0x81   : > { %s3176_s8 = scalar_lea.vmem %s504_s12, 16  ;;  %s3300_s24 = smov [#allocation8]  }
  0x82   : > { %p3177_p4 = scmp.ne.s32.totalorder %s504_s12, %s3176_s8  ;;  %s3181_s15 = sshll.u32 %s3300_s24, 4  ;;  %s3182_s15 = int_to_ptr.vmem [resolvable:$false] %s3181_s15 }
  0x83   : > { %s3183_s16 = scalar_lea.vmem %s3182_s15, 32  ;;  %p3184_p9 = scmp.lt.s32.totalorder %s504_s12, %s3182_s15 }
  0x84   : > { %p3179_p11 = pnand %p3177_p4, %p3463_p10  ;;  %p3185_p0 = scmp.lt.s32.totalorder %s3183_s16, %s3176_s8 }
  0x86   : > { %p3180_p13 = pneg %p3179_p11  ;;  %p3186_p8 = por %p3185_p0, %p3184_p9 }
  0x88   : > { %p3187_p1 = pnand %p3186_p8, %p3180_p13 }
  0x8a   : > { %3190 = shalt.err (!%p3187_p1)
}
  0x8b   : > { %p4052_p7 = scmp.ne.s32.totalorder %s4045_s25, 0  ;;  %s534_s5 = scalar_lea.vmem [#allocation11], %s3436_s23 }
  0x8c   : > { %s541_s10 = sshll.u32 %s534_s5, 4  ;;  %s3191_s6 = scalar_lea.hbm %s3570_s19, 16  ;;  %s542_s10 = int_to_ptr.vmem [resolvable:$true] %s541_s10 }
  0x8d   : > { %2861 = dma.hbm_to_vmem [thread:$0]  (!%p4052_p7), %s3541_s11, 16, %s504_s12, %s3457_s21  }
  0x8e   : > { %p3192_p12 = scmp.ne.s32.totalorder %s3570_s19, %s3191_s6  ;;  %s3196_s27 = scalar_lea.hbm %s4017_s9, 32 }
  0x8f   : > { %p3197_p5 = scmp.lt.u32.totalorder %s3570_s19, %s4017_s9  ;;  %p3198_p6 = scmp.lt.u32.totalorder %s3196_s27, %s3191_s6 }
  0x90   : > { %p3194_p3 = pnand %p3192_p12, %p3463_p10  ;;  %p3200_p4 = scmp.lt.u32.totalorder %s3191_s6, %s3570_s19 }
  0x91   : > { %p3199_p2 = por %p3198_p6, %p3197_p5 }
  0x92   : > { %p3195_p8 = pneg %p3194_p3 }
  0x93   : > { %p3201_p11 = por %p3200_p4, %p3199_p2 }
  0x95   : > { %p3202_p13 = pnand %p3201_p11, %p3195_p8 }
  0x97   : > { %3205 = shalt.err (!%p3202_p13)
}
  0x98   : > { %s3206_s21 = scalar_lea.vmem %s542_s10, 16  ;;  %s3301_s23 = smov [#allocation11]  }
  0x99   : > { %p3207_p9 = scmp.ne.s32.totalorder %s542_s10, %s3206_s21  ;;  %s3211_s11 = sshll.u32 %s3301_s23, 4  ;;  %s3212_s11 = int_to_ptr.vmem [resolvable:$false] %s3211_s11 }
  0x9a   : > { %s3213_s12 = scalar_lea.vmem %s3212_s11, 32  ;;  %p3214_p12 = scmp.lt.s32.totalorder %s542_s10, %s3212_s11 }
  0x9b   : > { %p3209_p0 = pnand %p3207_p9, %p3463_p10  ;;  %p3215_p3 = scmp.lt.s32.totalorder %s3213_s12, %s3206_s21 }
  0x9d   : > { %p3210_p1 = pneg %p3209_p0  ;;  %p3216_p7 = por %p3215_p3, %p3214_p12 }
  0x9f   : > { %p3217_p5 = pnand %p3216_p7, %p3210_p1 }
  0xa1   : > { %3220 = shalt.err (!%p3217_p5)
}
  0xa2   : > { %p4053_p6 = scmp.ne.s32.totalorder %s4045_s25, 0  ;;  %p4054_p8 = scmp.ne.s32.totalorder %s4048_s26, 0 }
  0xa3   : > { %s3612_s18 = sand.u32 (!%p4054_p8), 1, %s3285_s30   ;;  %p4055_p10 = scmp.ne.s32.totalorder (!%p4054_p8), %s4044_s22, 0 }
  0xa4   : > { %2867 = dma.hbm_to_vmem [thread:$0]  (!%p4053_p6), %s3570_s19, 16, %s542_s10, %s3504_s20  }
  0xa5   : > { %564 = sbr.rel (%p4054_p8) target bundleno = 4838 (0x12e6), region = 76  ;;  %s567_s28 = scalar_lea.sflag (!%p4054_p8), [#allocation4], %s3612_s18 }
  0xac   : > { %3264 = dma.done.wait (%p4055_p10), %s567_s28, 16  }
  0xad   : > { %3266 = vsyncadd (%p4055_p10), %s567_s28, 4294967280  ;;  %s574_s25 = sand.u32 1, %s3414_s17  }
  0xae   : > { %s575_s20 = scalar_lea.sflag [#allocation7], %s574_s25 }
  0xaf   : > { %3268 = dma.done.wait (%p4055_p10), %s575_s20, 32  }
  0xb0   : > { %3270 = vsyncadd (%p4055_p10), %s575_s20, 4294967264  ;;  %s2592_s19 = sshll.u32 %s3612_s18, 4  ;;  %s591_s15 = scalar_lea.sflag [#allocation10], %s574_s25 }
  0xb1   : > { %s3628_s16 = scalar_lea.vmem [#allocation9], %s2592_s19 }
  0xb2   : > { %3272 = dma.done.wait (%p4055_p10), %s591_s15, 272  }
  0xb3   : > { %3274 = vsyncadd (%p4055_p10), %s591_s15, 4294967024  ;;  %p682_p7 = scmp.lt.s32.totalorder %s3414_s17, 1  ;;  %s4056_s15 = sld [smem:[#allocation24_spill]] }
  0xb4   : > { %s4057_s27 = sld [smem:[#allocation25_spill]]  ;;  %s602_s26 = scalar_lea.vmem [#allocation11], %s3612_s18 }
  0xb5   : > { %s3636_s5 = scalar_select %p682_p7, %s3414_s17, 1 }
  0xb6   : > { %p2599_p2 = scmp.ne.s32.totalorder %s3414_s17, 0 }
  0xb7   : > { %s684_s13 = scalar_lea.vmem %s4009_s1, %s3636_s5  ;;  %s687_s22 = scalar_lea.vmem %s4010_s2, %s3636_s5  ;;  %vm715_vm0 = vcmask (!%p2599_p2), 261120  }
  0xb8   : > { %s2653_s0 = sshll.u32 %s3636_s5, 4  ;;  %s2655_s14 = sshll.u32 %s3636_s5, 5 }
  0xb9   : > { %s3651_s11 = scalar_lea.vmem %s4011_s3, %s2653_s0  ;;  %s3656_s25 = scalar_lea.vmem %s4012_s4, %s2653_s0 }
  0xba   : > { %s3661_s10 = scalar_lea.vmem %s4056_s15, %s2655_s14  ;;  %s705_s24 = scalar_lea.vmem %s4057_s27, %s3636_s5 }
  0xbb   : > { %710 = sbr.rel (%p2599_p2) target bundleno = 196 (0xc4), region = 100  ;;  %s4058_s8 = sld [smem:[#allocation20_spill]] (!%p2599_p2) }
  0xc1   : > { %v711_v0 = vld [vmem:[%s4058_s8] sm:$0xff] (!%p2599_p2)  ;;  %v712_v1 = vld [vmem:[%s4058_s8 + $0x8] sm:$0xff] (!%p2599_p2)  ;;  %v713_v2 = vld [vmem:[%s4058_s8 + $0x10] sm:$0xff] (!%p2599_p2) }
  0xc2   : > { %716 = vst.msk [vmem:[#allocation2] sm:$0xff] %vm715_vm0, %v711_v0  ;;  %717 = vst.msk [vmem:[#allocation2 + $0x8] sm:$0xff] %vm715_vm0, %v712_v1  ;;  %v714_v3 = vld [vmem:[%s4058_s8 + $0x18] sm:$0xff] }
  0xc3   : > { %718 = vst.msk [vmem:[#allocation2 + $0x10] sm:$0xff] %vm715_vm0, %v713_v2  ;;  %719 = vst.msk [vmem:[#allocation2 + $0x18] sm:$0xff] %vm715_vm0, %v714_v3 }
  0xc4 PF: > { %vm726_vm1 = vcmask 261120   ;;  %v2953_v32 = vld [vmem:[%s3651_s11] sm:$0xff]   ;;  %v2954_v33 = vld [vmem:[%s3651_s11 + $0x8] sm:$0xff]   ;;  %v3302_v2 = vmov 0.0   ;;  %vm3303_vm2 = vmmov 0   ;;  %vm878_vm3 = vcmask 64512  }
  0xc5   : > { %2706 = vmatprep.subr.bf16.mxu0 %v2953_v32  ;;  %v2600_v48 = vld [vmem:[%s684_s13] ss:$0 sm:$0xff]  ;;  %2714 = vmatprep.subr.bf16.mxu1 %v3302_v2  ;;  %s3304_s13 = smov 96   ;;  %vm976_vm4 = vcmask 130048   ;;  %s3306_s27 = smov 88   ;;  %vm1899_vm5 = vcmask 195584  }
  0xc6   : > { %2707 = vmatpush3.bf16.msra.mxu0 %v2953_v32  ;;  %v2601_v54 = vld [vmem:[%s687_s22] ss:$0 sm:$0xff]  ;;  %2716 = vmatprep.mubr.msk.bf16.mxu1 %vm3303_vm2, %v3302_v2  ;;  %s3305_s22 = smov 64   ;;  %s3307_s21 = smov 120   ;;  %vm2228_vm6 = vcmask 523264  }
  0xc7   : > { %2708 = vmatprep.subr.bf16.mxu0 %v2954_v33  ;;  %s3308_s23 = smov 56   ;;  %s3309_s0 = smov 80  }
  0xc8   : > { %s3310_s12 = smov 112   ;;  %s3311_s28 = smov 48  }
  0xc9   : > { %s3312_s14 = smov 72   ;;  %s3313_s20 = smov 104  }
  0xca   : > { %v722_v5 = vld [vmem:[#allocation2 + $0x10] sm:$0xff]  ;;  %v723_v9 = vld [vmem:[#allocation2 + $0x18] sm:$0xff]  ;;  %2709 = vmatpush3.bf16.msra.mxu0 %v2954_v33  ;;  %s3314_s19 = smov 40   ;;  %s3315_s11 = smov 8  }
  0xcb   : > { %v720_v4 = vld [vmem:[#allocation2] sm:$0xff]  ;;  %v721_v6 = vld [vmem:[#allocation2 + $0x8] sm:$0xff]  ;;  %v733_v8 = vsel %vm726_vm1, %v722_v5, 0.0  ;;  %v736_v11 = vsel %vm726_vm1, %v723_v9, 0.0  ;;  %2720 = vmatprep.subr.bf16.mxu0 %v3302_v2  ;;  %s3316_s15 = smov 16   ;;  %s3317_s6 = smov 24  }
  0xcc   : > { %v727_v7 = vsel %vm726_vm1, %v720_v4, 0.0  ;;  %734 = vadd.xlane.f32.xlu1 %v733_v8  ;;  %v730_v10 = vsel %vm726_vm1, %v721_v6, 0.0  ;;  %s4061_s29 = scalar_lea.vmem [#allocation8], %s3612_s18  ;;  %p2645_p4 = scmp.ne.s32.totalorder %s3414_s17, 1 }
  0xcd   : > { %728 = vadd.xlane.f32.xlu0 %v727_v7 }
  0xd0   : > { %737 = vadd.xlane.f32.xlu1 %v736_v11 }
  0xd1   : > { %731 = vadd.xlane.f32.xlu0 %v730_v10 }
 0x159   : > { %v735_v13 = vpop.xlane.xlu1 %734 }
 0x15a   : > { %v729_v12 = vpop.xlane.xlu0 %728  ;;  %v742_v15 = vmul.f32 0.03125, %v735_v13 }
 0x15b   : > { %v740_v14 = vmul.f32 0.03125, %v729_v12 }
 0x15c   : > { %v746_v17 = vsub.f32 %v722_v5, %v742_v15 }
 0x15d   : > { %v744_v16 = vsub.f32 %v720_v4, %v740_v14  ;;  %v738_v19 = vpop.xlane.xlu1 %737 }
 0x15e   : > { %v732_v18 = vpop.xlane.xlu0 %731  ;;  %v743_v21 = vmul.f32 0.03125, %v738_v19  ;;  %v750_v23 = vmul.f32 %v746_v17, %v746_v17 }
 0x15f   : > { %v741_v20 = vmul.f32 0.03125, %v732_v18  ;;  %v748_v22 = vmul.f32 %v744_v16, %v744_v16 }
 0x160   : > { %v747_v25 = vsub.f32 %v723_v9, %v743_v21  ;;  %v758_v27 = vsel %vm726_vm1, %v750_v23, 0.0 }
 0x161   : > { %v745_v24 = vsub.f32 %v721_v6, %v741_v20  ;;  %v752_v26 = vsel %vm726_vm1, %v748_v22, 0.0 }
 0x162   : > { %753 = vadd.xlane.f32.xlu0 %v752_v26  ;;  %v751_v29 = vmul.f32 %v747_v25, %v747_v25 }
 0x163   : > { %v749_v28 = vmul.f32 %v745_v24, %v745_v24 }
 0x164   : > { %v761_v31 = vsel %vm726_vm1, %v751_v29, 0.0 }
 0x165   : > { %v755_v30 = vsel %vm726_vm1, %v749_v28, 0.0 }
 0x166   : > { %759 = vadd.xlane.f32.xlu0 %v758_v27  ;;  %756 = vadd.xlane.f32.xlu1 %v755_v30 }
 0x16a   : > { %762 = vadd.xlane.f32.xlu1 %v761_v31 }
 0x1ef   : > { %v754_v34 = vpop.xlane.xlu0 %753 }
 0x1f0   : > { %v764_v35 = vmul.f32 0.03125, %v754_v34 }
 0x1f2   : > { %v768_v36 = vadd.f32 1e-05, %v764_v35 }
 0x1f3   : > { %v757_v37 = vpop.xlane.xlu1 %756  ;;  %v760_v38 = vpop.xlane.xlu0 %759 }
 0x1f4   : > { %2963 = vrsqrt.f32 %v768_v36  ;;  %v765_v39 = vmul.f32 0.03125, %v757_v37  ;;  %v766_v40 = vmul.f32 0.03125, %v760_v38 }
 0x1f6   : > { %v769_v41 = vadd.f32 1e-05, %v765_v39  ;;  %v770_v42 = vadd.f32 1e-05, %v766_v40 }
 0x1f7   : > { %v763_v43 = vpop.xlane.xlu1 %762 }
 0x1f8   : > { %2965 = vrsqrt.f32 %v769_v41  ;;  %v767_v44 = vmul.f32 0.03125, %v763_v43 }
 0x1f9   : > { %2967 = vrsqrt.f32 %v770_v42 }
 0x1fa   : > { %v771_v45 = vadd.f32 1e-05, %v767_v44 }
 0x1fc   : > { %2969 = vrsqrt.f32 %v771_v45 }
 0x1fe   : > { %v2964_v46 = vpop.eup %2963 }
 0x1ff   : > { %v776_v47 = vmul.f32 %v2964_v46, %v744_v16 }
 0x201   : > { %v786_v52 = vmul.f32 %v2600_v48, %v776_v47 }
 0x202   : > { %v2966_v49 = vpop.eup %2965 }
 0x203   : > { %v2968_v50 = vpop.eup %2967  ;;  %v777_v51 = vmul.f32 %v2966_v49, %v745_v24  ;;  %v796_v58 = vadd.f32 %v2601_v54, %v786_v52 }
 0x204   : > { %v778_v53 = vmul.f32 %v2968_v50, %v746_v17 }
 0x205   : > { %v787_v55 = vmul.f32 %v2600_v48, %v777_v51 }
 0x206   : > { %v2970_v56 = vpop.eup %2969  ;;  %v788_v60 = vmul.f32 %v2600_v48, %v778_v53 }
 0x207   : > { %v779_v57 = vmul.f32 %v2970_v56, %v747_v25  ;;  %v797_v59 = vadd.f32 %v2601_v54, %v787_v55 }
 0x208   : > { %v798_v63 = vadd.f32 %v2601_v54, %v788_v60 }
 0x209   : > { %v800_v61 = vpack.c.bf16 %v797_v59, %v796_v58  ;;  %v789_v62 = vmul.f32 %v2600_v48, %v779_v57 }
 0x20b   : > { %2710 = vmatprep.mubr.msk.bf16.mxu0 %vm726_vm1, %v800_v61  ;;  %v799_v0 = vadd.f32 %v2601_v54, %v789_v62 }
 0x20d   : > { %v801_v1 = vpack.c.bf16 %v799_v0, %v798_v63 }
 0x20f   : > { %2711 = vmatmul.mubr.msk.bf16.vlgmr.msra.gmra.mrb[0].mxu0 %vm726_vm1, %v801_v1 }
 0x210   : > { %2722 = vmatprep.mubr.msk.bf16.mxu0 %vm3303_vm2, %v3302_v2 }
 0x2e2   : > { %v2712_v3 = vpop.f32.mrb[0].mxu0 }
 0x2e3   : > { %v858_v4 = vpop.f32.mrb[1].mxu0 }
 0x2e4   : > { %v2713_v5 = vpop.f32.mrb[2].mxu0 }
 0x2e5   : > { %v3709_v6 = vpack.c.bf16 %v2713_v5, %v2712_v3  ;;  %v861_v7 = vpop.f32.mrb[3].mxu0 }
 0x2e6   : > { %v3711_v8 = vpack.c.bf16 %v861_v7, %v858_v4 }
 0x2e7   : > { %927 = vrot.lane.b32.xlu1 %v3709_v6, %s3304_s13 }
 0x2e8   : > { %876 = vrot.lane.b32.xlu0 %v3711_v8, %s3304_s13  ;;  %s4063_s13 = sld [smem:[#allocation26_spill]] (!%p2645_p4) }
 0x359   : > { %v928_v9 = vpop.permute.xlu1 %927 }
 0x35a   : > { %v933_v10 = vsel %vm878_vm3, %v928_v9, 0  ;;  %v877_v11 = vpop.permute.xlu0 %876 }
 0x35b   : > { %2721 = vmatpush3.bf16.xpose.msra.mxu0 %v933_v10  ;;  %v883_v12 = vsel %vm878_vm3, %v877_v11, 0 }
 0x35c   : > { %2715 = vmatpush3.bf16.xpose.msra.mxu1 %v883_v12  ;;  %2732 = vmatprep.subr.bf16.mxu0 %v3302_v2 }
 0x35d   : > { %2726 = vmatprep.subr.bf16.mxu1 %v3302_v2 }
 0x362   : > { %2723 = vmatmul.mubr.msk.bf16.vlgmr.msra.gmra.mrb[4].mxu0 %vm878_vm3, %v3709_v6 }
 0x363   : > { %2717 = vmatmul.mubr.msk.bf16.vlgmr.msra.gmra.mrb[0].mxu1 %vm878_vm3, %v3711_v8  ;;  %2734 = vmatprep.mubr.msk.bf16.mxu0 %vm3303_vm2, %v3302_v2 }
 0x364   : > { %2728 = vmatprep.mubr.msk.bf16.mxu1 %vm3303_vm2, %v3302_v2 }
 0x435   : > { %v969_v13 = vpop.f32.mrb[4].mxu0 }
 0x436   : > { %v919_v14 = vpop.f32.mrb[0].mxu1  ;;  %v2724_v15 = vpop.f32.mrb[5].mxu0  ;;  %v983_v24 = vsel %vm976_vm4, %v969_v13, -inf }
 0x437   : > { %v2718_v16 = vpop.f32.mrb[1].mxu1  ;;  %v972_v17 = vpop.f32.mrb[6].mxu0  ;;  %v977_v18 = vsel %vm976_vm4, %v919_v14, -inf }
 0x438   : > { %v2725_v19 = vpop.f32.mrb[7].mxu0  ;;  %978 = vmax.xlane.f32.xlu1 %v977_v18  ;;  %v922_v20 = vpop.f32.mrb[2].mxu1  ;;  %v986_v23 = vsel %vm976_vm4, %v972_v17, -inf }
 0x439   : > { %v2719_v21 = vpop.f32.mrb[3].mxu1  ;;  %v980_v22 = vsel %vm976_vm4, %v922_v20, -inf }
 0x43a   : > { %981 = vmax.xlane.f32.xlu0 %v980_v22 }
 0x43c   : > { %987 = vmax.xlane.f32.xlu1 %v986_v23 }
 0x43e   : > { %984 = vmax.xlane.f32.xlu0 %v983_v24 }
 0x44d   : > { %1070 = vrot.lane.b32.xlu1 %v3709_v6, %s3305_s22 }
 0x451   : > { %1119 = vrot.lane.b32.xlu1 %v3711_v8, %s3306_s27 }
 0x4c5   : > { %v979_v25 = vpop.xlane.xlu1 %978 }
 0x4c6   : > { %v989_v29 = vsub.f32 %v919_v14, %v979_v25 }
 0x4c7   : > { %v982_v26 = vpop.xlane.xlu0 %981 }
 0x4c8   : > { %v990_v27 = vsub.f32 %v922_v20, %v982_v26  ;;  %v993_v36 = vmul.f32 1.442695, %v989_v29 }
 0x4c9   : > { %v988_v28 = vpop.xlane.xlu1 %987 }
 0x4ca   : > { %v992_v30 = vsub.f32 %v972_v17, %v988_v28  ;;  %v995_v31 = vmul.f32 1.442695, %v990_v27 }
 0x4cb   : > { %v985_v32 = vpop.xlane.xlu0 %984 }
 0x4cc   : > { %v999_v33 = vmul.f32 1.442695, %v992_v30  ;;  %v991_v34 = vsub.f32 %v969_v13, %v985_v32 }
 0x4cd   : > { %v1071_v35 = vpop.permute.xlu1 %1070 }
 0x4ce   : > { %2971 = vpow2.f32 %v999_v33  ;;  %v997_v37 = vmul.f32 1.442695, %v991_v34  ;;  %2733 = vmatpush3.bf16.msra.mxu0 %v1071_v35 }
 0x4cf   : > { %2973 = vpow2.f32 %v995_v31  ;;  %2744 = vmatprep.subr.bf16.mxu0 %v3302_v2 }
 0x4d0   : > { %2975 = vpow2.f32 %v997_v37 }
 0x4d1   : > { %2977 = vpow2.f32 %v993_v36  ;;  %v1120_v46 = vpop.permute.xlu1 %1119 }
 0x4d2   : > { %v1125_v0 = vsel %vm878_vm3, %v1120_v46, 0 }
 0x4d8   : > { %v2972_v38 = vpop.eup %2971 }
 0x4d9   : > { %v2974_v39 = vpop.eup %2973  ;;  %v1010_v40 = vsel %vm976_vm4, %v2972_v38, 0.0 }
 0x4da   : > { %v2976_v41 = vpop.eup %2975  ;;  %1011 = vadd.xlane.f32.xlu1 %v1010_v40  ;;  %v1004_v44 = vsel %vm976_vm4, %v2974_v39, 0.0 }
 0x4db   : > { %v1007_v42 = vsel %vm976_vm4, %v2976_v41, 0.0  ;;  %v2978_v43 = vpop.eup %2977 }
 0x4dc   : > { %1008 = vadd.xlane.f32.xlu0 %v1007_v42  ;;  %v1001_v45 = vsel %vm976_vm4, %v2978_v43, 0.0 }
 0x4de   : > { %1005 = vadd.xlane.f32.xlu1 %v1004_v44 }
 0x4e0   : > { %1002 = vadd.xlane.f32.xlu0 %v1001_v45 }
 0x4ef   : > { %1170 = vrot.lane.b32.xlu1 %v3709_v6, %s3306_s27 }
 0x4f3   : > { %1168 = vrot.lane.b32.xlu1 %v3709_v6, %s3307_s21 }
 0x4f6   : > { %1023 = vrot.lane.b32.xlu0 %v3711_v8, %s3305_s22 }
 0x4fa   : > { %1117 = vrot.lane.b32.xlu0 %v3711_v8, %s3307_s21  ;;  %s4064_s21 = sld [smem:[#allocation27_spill]] (!%p2645_p4) }
 0x567   : > { %v1012_v47 = vpop.xlane.xlu1 %1011 }
 0x568   : > { %2979 = vrcp.f32 %v1012_v47 }
 0x569   : > { %v1009_v48 = vpop.xlane.xlu0 %1008 }
 0x56a   : > { %2981 = vrcp.f32 %v1009_v48 }
 0x56b   : > { %v1006_v49 = vpop.xlane.xlu1 %1005 }
 0x56c   : > { %2983 = vrcp.f32 %v1006_v49 }
 0x56d   : > { %v1003_v50 = vpop.xlane.xlu0 %1002 }
 0x56e   : > { %2985 = vrcp.f32 %v1003_v50 }
 0x56f   : > { %v1171_v57 = vpop.permute.xlu1 %1170 }
 0x570   : > { %v1176_v62 = vsel %vm878_vm3, %v1171_v57, 0 }
 0x571   : > { %v1024_v51 = vpop.permute.xlu0 %1023 }
 0x572   : > { %v2980_v52 = vpop.eup %2979  ;;  %2727 = vmatpush3.bf16.msra.mxu1 %v1024_v51 }
 0x573   : > { %2738 = vmatprep.subr.bf16.mxu1 %v3302_v2  ;;  %v1020_v54 = vmul.f32 %v2980_v52, %v2972_v38  ;;  %v1169_v1 = vpop.permute.xlu1 %1168 }
 0x574   : > { %v2982_v53 = vpop.eup %2981 }
 0x575   : > { %v1019_v55 = vmul.f32 %v2982_v53, %v2976_v41  ;;  %v1118_v3 = vpop.permute.xlu0 %1117 }
 0x576   : > { %v2984_v56 = vpop.eup %2983 }
 0x577   : > { %v1022_v58 = vpack.c.bf16 %v1020_v54, %v1019_v55  ;;  %v1018_v60 = vmul.f32 %v2984_v56, %v2974_v39 }
 0x578   : > { %v2986_v59 = vpop.eup %2985 }
 0x579   : > { %v1017_v61 = vmul.f32 %v2986_v59, %v2978_v43  ;;  %2735 = vmatmul.mubr.msk.bf16.vlgmr.msra.gmra.mrb[8].mxu0 %vm976_vm4, %v1022_v58 }
 0x57a   : > { %2745 = vmatpush3.bf16.xpose.msra.mxu0 %v1176_v62  ;;  %2746 = vmatprep.mubr.msk.bf16.mxu0 %vm3303_vm2, %v3302_v2 }
 0x57b   : > { %v1021_v63 = vpack.c.bf16 %v1018_v60, %v1017_v61  ;;  %2756 = vmatprep.subr.bf16.mxu0 %v3302_v2 }
 0x57d   : > { %2729 = vmatmul.mubr.msk.bf16.vlgmr.msra.gmra.mrb[4].mxu1 %vm976_vm4, %v1021_v63 }
 0x57e   : > { %2739 = vmatpush3.bf16.xpose.msra.mxu1 %v1125_v0  ;;  %2740 = vmatprep.mubr.msk.bf16.mxu1 %vm3303_vm2, %v3302_v2 }
 0x57f   : > { %2750 = vmatprep.subr.bf16.mxu1 %v3302_v2 }
 0x581   : > { %2747 = vmatmul.mubr.msk.bf16.vlgmr.msra.gmra.mrb[12].mxu0 %vm878_vm3, %v1169_v1 }
 0x582   : > { %2758 = vmatprep.mubr.msk.bf16.mxu0 %vm3303_vm2, %v3302_v2 }
 0x585   : > { %2741 = vmatmul.mubr.msk.bf16.vlgmr.msra.gmra.mrb[8].mxu1 %vm878_vm3, %v1118_v3 }
 0x586   : > { %2752 = vmatprep.mubr.msk.bf16.mxu1 %vm3303_vm2, %v3302_v2 }
 0x64c   : > { %v3763_v4 = vpop.f32.mrb[8].mxu0 }
 0x64d   : > { %v2736_v5 = vpop.f32.mrb[9].mxu0 }
 0x64e   : > { %v3765_v7 = vpop.f32.mrb[10].mxu0 }
 0x64f   : > { %v2737_v9 = vpop.f32.mrb[11].mxu0 }
 0x650   : > { %v3767_v10 = vpop.f32.mrb[4].mxu1 }
 0x651   : > { %v2730_v11 = vpop.f32.mrb[5].mxu1 }
 0x652   : > { %v3769_v12 = vpop.f32.mrb[6].mxu1 }
 0x653   : > { %v2731_v13 = vpop.f32.mrb[7].mxu1 }
 0x654   : > { %v1212_v14 = vpop.f32.mrb[12].mxu0 }
 0x655   : > { %v2748_v15 = vpop.f32.mrb[13].mxu0  ;;  %v1225_v24 = vsel %vm976_vm4, %v1212_v14, -inf }
 0x656   : > { %v1215_v16 = vpop.f32.mrb[14].mxu0 }
 0x657   : > { %v2749_v17 = vpop.f32.mrb[15].mxu0  ;;  %v1228_v25 = vsel %vm976_vm4, %v1215_v16, -inf }
 0x658   : > { %v1161_v18 = vpop.f32.mrb[8].mxu1 }
 0x659   : > { %v2742_v19 = vpop.f32.mrb[9].mxu1  ;;  %v1219_v20 = vsel %vm976_vm4, %v1161_v18, -inf }
 0x65a   : > { %1220 = vmax.xlane.f32.xlu0 %v1219_v20  ;;  %v1164_v21 = vpop.f32.mrb[10].mxu1 }
 0x65b   : > { %v2743_v22 = vpop.f32.mrb[11].mxu1  ;;  %v1222_v23 = vsel %vm976_vm4, %v1164_v21, -inf }
 0x65c   : > { %1223 = vmax.xlane.f32.xlu1 %v1222_v23 }
 0x65e   : > { %1226 = vmax.xlane.f32.xlu0 %v1225_v24 }
 0x662   : > { %1229 = vmax.xlane.f32.xlu0 %v1228_v25 }
 0x66d   : > { %1312 = vrot.lane.b32.xlu1 %v3709_v6, %s3308_s23 }
 0x671   : > { %1361 = vrot.lane.b32.xlu1 %v3711_v8, %s3309_s0 }
 0x6e7   : > { %v1221_v26 = vpop.xlane.xlu0 %1220 }
 0x6e8   : > { %v1231_v28 = vsub.f32 %v1161_v18, %v1221_v26 }
 0x6e9   : > { %v1224_v27 = vpop.xlane.xlu1 %1223 }
 0x6ea   : > { %v1235_v32 = vmul.f32 1.442695, %v1231_v28  ;;  %v1232_v33 = vsub.f32 %v1164_v21, %v1224_v27 }
 0x6eb   : > { %v1227_v29 = vpop.xlane.xlu0 %1226 }
 0x6ec   : > { %v1233_v30 = vsub.f32 %v1212_v14, %v1227_v29  ;;  %v1237_v37 = vmul.f32 1.442695, %v1232_v33 }
 0x6ed   : > { %v1313_v31 = vpop.permute.xlu1 %1312 }
 0x6ee   : > { %v1239_v34 = vmul.f32 1.442695, %v1233_v30  ;;  %2757 = vmatpush3.bf16.msra.mxu0 %v1313_v31 }
 0x6ef   : > { %v1230_v35 = vpop.xlane.xlu0 %1229  ;;  %2768 = vmatprep.subr.bf16.mxu0 %v3302_v2 }
 0x6f0   : > { %2987 = vpow2.f32 %v1239_v34  ;;  %v1234_v36 = vsub.f32 %v1215_v16, %v1230_v35 }
 0x6f1   : > { %2989 = vpow2.f32 %v1235_v32  ;;  %v1362_v47 = vpop.permute.xlu1 %1361 }
 0x6f2   : > { %v1241_v38 = vmul.f32 1.442695, %v1234_v36  ;;  %v1367_v1 = vsel %vm878_vm3, %v1362_v47, 0 }
 0x6f4   : > { %2991 = vpow2.f32 %v1241_v38 }
 0x6f5   : > { %2993 = vpow2.f32 %v1237_v37 }
 0x6fa   : > { %v2988_v39 = vpop.eup %2987 }
 0x6fb   : > { %v1249_v40 = vsel %vm976_vm4, %v2988_v39, 0.0  ;;  %v2990_v41 = vpop.eup %2989 }
 0x6fc   : > { %1250 = vadd.xlane.f32.xlu0 %v1249_v40  ;;  %v1243_v43 = vsel %vm976_vm4, %v2990_v41, 0.0 }
 0x6fe   : > { %v2992_v42 = vpop.eup %2991 }
 0x6ff   : > { %v1252_v44 = vsel %vm976_vm4, %v2992_v42, 0.0  ;;  %v2994_v45 = vpop.eup %2993 }
 0x700   : > { %1244 = vadd.xlane.f32.xlu0 %v1243_v43  ;;  %1253 = vadd.xlane.f32.xlu1 %v1252_v44  ;;  %v1246_v46 = vsel %vm976_vm4, %v2994_v45, 0.0 }
 0x704   : > { %1247 = vadd.xlane.f32.xlu1 %v1246_v46 }
 0x715   : > { %1412 = vrot.lane.b32.xlu1 %v3709_v6, %s3309_s0 }
 0x716   : > { %1265 = vrot.lane.b32.xlu0 %v3711_v8, %s3308_s23 }
 0x719   : > { %1410 = vrot.lane.b32.xlu1 %v3709_v6, %s3310_s12 }
 0x71a   : > { %1359 = vrot.lane.b32.xlu0 %v3711_v8, %s3310_s12 }
 0x789   : > { %v1251_v48 = vpop.xlane.xlu0 %1250 }
 0x78a   : > { %2995 = vrcp.f32 %v1251_v48 }
 0x78d   : > { %v1245_v49 = vpop.xlane.xlu0 %1244  ;;  %v1254_v50 = vpop.xlane.xlu1 %1253 }
 0x78e   : > { %2997 = vrcp.f32 %v1254_v50 }
 0x78f   : > { %2999 = vrcp.f32 %v1245_v49 }
 0x791   : > { %v1266_v51 = vpop.permute.xlu0 %1265  ;;  %v1248_v52 = vpop.xlane.xlu1 %1247 }
 0x792   : > { %3001 = vrcp.f32 %v1248_v52  ;;  %2751 = vmatpush3.bf16.msra.mxu1 %v1266_v51 }
 0x793   : > { %2762 = vmatprep.subr.bf16.mxu1 %v3302_v2 }
 0x794   : > { %v2996_v53 = vpop.eup %2995 }
 0x795   : > { %v1261_v56 = vmul.f32 %v2996_v53, %v2988_v39  ;;  %v1413_v58 = vpop.permute.xlu1 %1412  ;;  %v1360_v5 = vpop.permute.xlu0 %1359 }
 0x796   : > { %v1418_v63 = vsel %vm878_vm3, %v1413_v58, 0 }
 0x798   : > { %v2998_v54 = vpop.eup %2997 }
 0x799   : > { %v3000_v55 = vpop.eup %2999  ;;  %v1262_v57 = vmul.f32 %v2998_v54, %v2992_v42  ;;  %v1411_v3 = vpop.permute.xlu1 %1410 }
 0x79a   : > { %v1259_v61 = vmul.f32 %v3000_v55, %v2990_v41 }
 0x79b   : > { %v1264_v60 = vpack.c.bf16 %v1262_v57, %v1261_v56 }
 0x79c   : > { %v3002_v59 = vpop.eup %3001 }
 0x79d   : > { %v1260_v62 = vmul.f32 %v3002_v59, %v2994_v45  ;;  %2759 = vmatmul.mubr.msk.bf16.vlgmr.msra.gmra.mrb[16].mxu0 %vm976_vm4, %v1264_v60 }
 0x79e   : > { %2769 = vmatpush3.bf16.xpose.msra.mxu0 %v1418_v63  ;;  %2770 = vmatprep.mubr.msk.bf16.mxu0 %vm3303_vm2, %v3302_v2 }
 0x79f   : > { %v1263_v0 = vpack.c.bf16 %v1260_v62, %v1259_v61  ;;  %2780 = vmatprep.subr.bf16.mxu0 %v3302_v2 }
 0x7a1   : > { %2753 = vmatmul.mubr.msk.bf16.vlgmr.msra.gmra.mrb[12].mxu1 %vm976_vm4, %v1263_v0 }
 0x7a2   : > { %2763 = vmatpush3.bf16.xpose.msra.mxu1 %v1367_v1  ;;  %2764 = vmatprep.mubr.msk.bf16.mxu1 %vm3303_vm2, %v3302_v2 }
 0x7a3   : > { %2774 = vmatprep.subr.bf16.mxu1 %v3302_v2 }
 0x7a5   : > { %2771 = vmatmul.mubr.msk.bf16.vlgmr.msra.gmra.mrb[20].mxu0 %vm878_vm3, %v1411_v3 }
 0x7a6   : > { %2782 = vmatprep.mubr.msk.bf16.mxu0 %vm3303_vm2, %v3302_v2 }
 0x7a9   : > { %2765 = vmatmul.mubr.msk.bf16.vlgmr.msra.gmra.mrb[16].mxu1 %vm878_vm3, %v1360_v5 }
 0x7aa   : > { %2776 = vmatprep.mubr.msk.bf16.mxu1 %vm3303_vm2, %v3302_v2 }
 0x870   : > { %v3807_v9 = vpop.f32.mrb[16].mxu0 }
 0x871   : > { %v2760_v11 = vpop.f32.mrb[17].mxu0 }
 0x872   : > { %v3809_v13 = vpop.f32.mrb[18].mxu0 }
 0x873   : > { %v2928_v14 = vpack.i.bf16 %v3809_v13, %v3807_v9  ;;  %v2761_v15 = vpop.f32.mrb[19].mxu0 }
 0x874   : > { %v3813_v16 = vpop.f32.mrb[12].mxu1 }
 0x875   : > { %v2754_v17 = vpop.f32.mrb[13].mxu1 }
 0x876   : > { %v3815_v18 = vpop.f32.mrb[14].mxu1 }
 0x877   : > { %v2923_v19 = vpack.i.bf16 %v3815_v18, %v3813_v16  ;;  %v2755_v20 = vpop.f32.mrb[15].mxu1 }
 0x878   : > { %v1454_v21 = vpop.f32.mrb[20].mxu0 }
 0x879   : > { %v2772_v22 = vpop.f32.mrb[21].mxu0  ;;  %v1467_v31 = vsel %vm976_vm4, %v1454_v21, -inf }
 0x87a   : > { %v1457_v23 = vpop.f32.mrb[22].mxu0 }
 0x87b   : > { %v2773_v24 = vpop.f32.mrb[23].mxu0  ;;  %v1470_v32 = vsel %vm976_vm4, %v1457_v23, -inf }
 0x87c   : > { %v1403_v25 = vpop.f32.mrb[16].mxu1 }
 0x87d   : > { %v2766_v26 = vpop.f32.mrb[17].mxu1  ;;  %v1461_v27 = vsel %vm976_vm4, %v1403_v25, -inf }
 0x87e   : > { %1462 = vmax.xlane.f32.xlu0 %v1461_v27  ;;  %v1406_v28 = vpop.f32.mrb[18].mxu1 }
 0x87f   : > { %v2767_v29 = vpop.f32.mrb[19].mxu1  ;;  %v1464_v30 = vsel %vm976_vm4, %v1406_v28, -inf }
 0x880   : > { %1465 = vmax.xlane.f32.xlu1 %v1464_v30 }
 0x882   : > { %1468 = vmax.xlane.f32.xlu0 %v1467_v31 }
 0x886   : > { %1471 = vmax.xlane.f32.xlu0 %v1470_v32 }
 0x891   : > { %1554 = vrot.lane.b32.xlu1 %v3709_v6, %s3311_s28 }
 0x895   : > { %1603 = vrot.lane.b32.xlu1 %v3711_v8, %s3312_s14 }
 0x90b   : > { %v1463_v33 = vpop.xlane.xlu0 %1462 }
 0x90c   : > { %v1473_v35 = vsub.f32 %v1403_v25, %v1463_v33 }
 0x90d   : > { %v1466_v34 = vpop.xlane.xlu1 %1465 }
 0x90e   : > { %v1477_v39 = vmul.f32 1.442695, %v1473_v35  ;;  %v1474_v40 = vsub.f32 %v1406_v28, %v1466_v34 }
 0x90f   : > { %v1469_v36 = vpop.xlane.xlu0 %1468 }
 0x910   : > { %v1475_v37 = vsub.f32 %v1454_v21, %v1469_v36  ;;  %v1479_v44 = vmul.f32 1.442695, %v1474_v40 }
 0x911   : > { %v1555_v38 = vpop.permute.xlu1 %1554 }
 0x912   : > { %v1481_v41 = vmul.f32 1.442695, %v1475_v37  ;;  %2781 = vmatpush3.bf16.msra.mxu0 %v1555_v38 }
 0x913   : > { %v1472_v42 = vpop.xlane.xlu0 %1471  ;;  %2792 = vmatprep.subr.bf16.mxu0 %v3302_v2 }
 0x914   : > { %3003 = vpow2.f32 %v1481_v41  ;;  %v1476_v43 = vsub.f32 %v1457_v23, %v1472_v42 }
 0x915   : > { %3005 = vpow2.f32 %v1477_v39  ;;  %v1604_v54 = vpop.permute.xlu1 %1603 }
 0x916   : > { %v1483_v45 = vmul.f32 1.442695, %v1476_v43  ;;  %v1609_v21 = vsel %vm878_vm3, %v1604_v54, 0 }
 0x918   : > { %3007 = vpow2.f32 %v1483_v45 }
 0x919   : > { %3009 = vpow2.f32 %v1479_v44 }
 0x91e   : > { %v3004_v46 = vpop.eup %3003 }
 0x91f   : > { %v1491_v47 = vsel %vm976_vm4, %v3004_v46, 0.0  ;;  %v3006_v48 = vpop.eup %3005 }
 0x920   : > { %1492 = vadd.xlane.f32.xlu0 %v1491_v47  ;;  %v1485_v50 = vsel %vm976_vm4, %v3006_v48, 0.0 }
 0x922   : > { %v3008_v49 = vpop.eup %3007 }
 0x923   : > { %v1494_v51 = vsel %vm976_vm4, %v3008_v49, 0.0  ;;  %v3010_v52 = vpop.eup %3009 }
 0x924   : > { %1486 = vadd.xlane.f32.xlu0 %v1485_v50  ;;  %1495 = vadd.xlane.f32.xlu1 %v1494_v51  ;;  %v1488_v53 = vsel %vm976_vm4, %v3010_v52, 0.0 }
 0x928   : > { %1489 = vadd.xlane.f32.xlu1 %v1488_v53 }
 0x939   : > { %1654 = vrot.lane.b32.xlu1 %v3709_v6, %s3312_s14 }
 0x93a   : > { %1507 = vrot.lane.b32.xlu0 %v3711_v8, %s3311_s28 }
 0x93d   : > { %1652 = vrot.lane.b32.xlu1 %v3709_v6, %s3313_s20 }
 0x93e   : > { %1601 = vrot.lane.b32.xlu0 %v3711_v8, %s3313_s20 }
 0x9ad   : > { %v1493_v55 = vpop.xlane.xlu0 %1492 }
 0x9ae   : > { %3011 = vrcp.f32 %v1493_v55 }
 0x9b1   : > { %v1487_v56 = vpop.xlane.xlu0 %1486  ;;  %v1496_v57 = vpop.xlane.xlu1 %1495 }
 0x9b2   : > { %3013 = vrcp.f32 %v1496_v57 }
 0x9b3   : > { %3015 = vrcp.f32 %v1487_v56 }
 0x9b5   : > { %v1508_v58 = vpop.permute.xlu0 %1507  ;;  %v1490_v59 = vpop.xlane.xlu1 %1489 }
 0x9b6   : > { %3017 = vrcp.f32 %v1490_v59  ;;  %2775 = vmatpush3.bf16.msra.mxu1 %v1508_v58 }
 0x9b7   : > { %2786 = vmatprep.subr.bf16.mxu1 %v3302_v2 }
 0x9b8   : > { %v3012_v60 = vpop.eup %3011 }
 0x9b9   : > { %v1503_v63 = vmul.f32 %v3012_v60, %v3004_v46  ;;  %v1655_v1 = vpop.permute.xlu1 %1654  ;;  %v1602_v23 = vpop.permute.xlu0 %1601 }
 0x9ba   : > { %v1660_v17 = vsel %vm878_vm3, %v1655_v1, 0 }
 0x9bc   : > { %v3014_v61 = vpop.eup %3013 }
 0x9bd   : > { %v3016_v62 = vpop.eup %3015  ;;  %v1504_v0 = vmul.f32 %v3014_v61, %v3008_v49  ;;  %v1653_v22 = vpop.permute.xlu1 %1652 }
 0x9be   : > { %v1501_v11 = vmul.f32 %v3016_v62, %v3006_v48 }
 0x9bf   : > { %v1506_v5 = vpack.c.bf16 %v1504_v0, %v1503_v63 }
 0x9c0   : > { %v3018_v3 = vpop.eup %3017 }
 0x9c1   : > { %v1502_v15 = vmul.f32 %v3018_v3, %v3010_v52  ;;  %2783 = vmatmul.mubr.msk.bf16.vlgmr.msra.gmra.mrb[24].mxu0 %vm976_vm4, %v1506_v5 }
 0x9c2   : > { %2793 = vmatpush3.bf16.xpose.msra.mxu0 %v1660_v17  ;;  %2794 = vmatprep.mubr.msk.bf16.mxu0 %vm3303_vm2, %v3302_v2 }
 0x9c3   : > { %v1505_v20 = vpack.c.bf16 %v1502_v15, %v1501_v11  ;;  %2804 = vmatprep.subr.bf16.mxu0 %v3302_v2 }
 0x9c5   : > { %2777 = vmatmul.mubr.msk.bf16.vlgmr.msra.gmra.mrb[20].mxu1 %vm976_vm4, %v1505_v20 }
 0x9c6   : > { %2787 = vmatpush3.bf16.xpose.msra.mxu1 %v1609_v21  ;;  %2788 = vmatprep.mubr.msk.bf16.mxu1 %vm3303_vm2, %v3302_v2 }
 0x9c7   : > { %2798 = vmatprep.subr.bf16.mxu1 %v3302_v2 }
 0x9c9   : > { %2795 = vmatmul.mubr.msk.bf16.vlgmr.msra.gmra.mrb[28].mxu0 %vm878_vm3, %v1653_v22  ;;  %v2955_v22 = vld [vmem:[%s3656_s25] sm:$0xff]  }
 0x9ca   : > { %2806 = vmatprep.mubr.msk.bf16.mxu0 %vm3303_vm2, %v3302_v2 }
 0x9cd   : > { %2789 = vmatmul.mubr.msk.bf16.vlgmr.msra.gmra.mrb[24].mxu1 %vm878_vm3, %v1602_v23  ;;  %v2956_v23 = vld [vmem:[%s3656_s25 + $0x8] sm:$0xff]   ;;  %s4059_s25 = scalar_lea.vmem [#allocation3], %s3612_s18 }
 0x9ce   : > { %2800 = vmatprep.mubr.msk.bf16.mxu1 %vm3303_vm2, %v3302_v2 }
 0xa94   : > { %v1594_v24 = vpop.f32.mrb[24].mxu0 }
 0xa95   : > { %v2784_v25 = vpop.f32.mrb[25].mxu0 }
 0xa96   : > { %v1597_v26 = vpop.f32.mrb[26].mxu0 }
 0xa97   : > { %v2938_v27 = vpack.i.bf16 %v1597_v26, %v1594_v24  ;;  %v2785_v28 = vpop.f32.mrb[27].mxu0 }
 0xa98   : > { %v1547_v29 = vpop.f32.mrb[20].mxu1 }
 0xa99   : > { %v2778_v30 = vpop.f32.mrb[21].mxu1 }
 0xa9a   : > { %v1550_v31 = vpop.f32.mrb[22].mxu1 }
 0xa9b   : > { %v2933_v32 = vpack.i.bf16 %v1550_v31, %v1547_v29  ;;  %v2779_v33 = vpop.f32.mrb[23].mxu1 }
 0xa9c   : > { %v1696_v34 = vpop.f32.mrb[28].mxu0 }
 0xa9d   : > { %v2796_v35 = vpop.f32.mrb[29].mxu0  ;;  %v1709_v43 = vsel %vm976_vm4, %v1696_v34, -inf }
 0xa9e   : > { %v1699_v36 = vpop.f32.mrb[30].mxu0 }
 0xa9f   : > { %v2797_v37 = vpop.f32.mrb[31].mxu0  ;;  %v1712_v44 = vsel %vm976_vm4, %v1699_v36, -inf }
 0xaa0   : > { %v1645_v38 = vpop.f32.mrb[24].mxu1 }
 0xaa1   : > { %v2790_v39 = vpop.f32.mrb[25].mxu1  ;;  %v1703_v40 = vsel %vm976_vm4, %v1645_v38, -inf }
 0xaa2   : > { %1704 = vmax.xlane.f32.xlu0 %v1703_v40  ;;  %v1648_v2 = vpop.f32.mrb[26].mxu1 }
 0xaa3   : > { %v2791_v41 = vpop.f32.mrb[27].mxu1  ;;  %v1706_v42 = vsel %vm976_vm4, %v1648_v2, -inf }
 0xaa4   : > { %1707 = vmax.xlane.f32.xlu1 %v1706_v42 }
 0xaa6   : > { %1710 = vmax.xlane.f32.xlu0 %v1709_v43 }
 0xaaa   : > { %1713 = vmax.xlane.f32.xlu0 %v1712_v44 }
 0xb2f   : > { %v1705_v45 = vpop.xlane.xlu0 %1704 }
 0xb30   : > { %v1715_v46 = vsub.f32 %v1645_v38, %v1705_v45 }
 0xb31   : > { %v1708_v47 = vpop.xlane.xlu1 %1707 }
 0xb32   : > { %v1719_v50 = vmul.f32 1.442695, %v1715_v46  ;;  %v1716_v51 = vsub.f32 %v1648_v2, %v1708_v47 }
 0xb33   : > { %v1711_v48 = vpop.xlane.xlu0 %1710 }
 0xb34   : > { %v1717_v49 = vsub.f32 %v1696_v34, %v1711_v48  ;;  %v1721_v55 = vmul.f32 1.442695, %v1716_v51 }
 0xb36   : > { %v1723_v52 = vmul.f32 1.442695, %v1717_v49 }
 0xb37   : > { %v1714_v53 = vpop.xlane.xlu0 %1713 }
 0xb38   : > { %3019 = vpow2.f32 %v1723_v52  ;;  %v1718_v54 = vsub.f32 %v1699_v36, %v1714_v53 }
 0xb39   : > { %3021 = vpow2.f32 %v1719_v50 }
 0xb3a   : > { %v1725_v56 = vmul.f32 1.442695, %v1718_v54 }
 0xb3c   : > { %3023 = vpow2.f32 %v1725_v56 }
 0xb3d   : > { %3025 = vpow2.f32 %v1721_v55 }
 0xb42   : > { %v3020_v57 = vpop.eup %3019 }
 0xb43   : > { %v1733_v58 = vsel %vm976_vm4, %v3020_v57, 0.0  ;;  %v3022_v59 = vpop.eup %3021 }
 0xb44   : > { %1734 = vadd.xlane.f32.xlu0 %v1733_v58  ;;  %v1727_v61 = vsel %vm976_vm4, %v3022_v59, 0.0 }
 0xb46   : > { %v3024_v60 = vpop.eup %3023 }
 0xb47   : > { %v1736_v62 = vsel %vm976_vm4, %v3024_v60, 0.0  ;;  %v3026_v63 = vpop.eup %3025 }
 0xb48   : > { %1728 = vadd.xlane.f32.xlu0 %v1727_v61  ;;  %1737 = vadd.xlane.f32.xlu1 %v1736_v62  ;;  %v1730_v0 = vsel %vm976_vm4, %v3026_v63, 0.0  ;;  %v2626_v62 = vld [vmem:[%s4059_s25] ss:$0 sm:$0xff] }
 0xb4c   : > { %1731 = vadd.xlane.f32.xlu1 %v1730_v0  ;;  %v3059_v0 = vld [vmem:[#allocation2 + $0x10] sm:$0xff] }
 0xb5d   : > { %1796 = vrot.lane.b32.xlu1 %v3709_v6, %s3314_s19 }
 0xb5e   : > { %1749 = vrot.lane.b32.xlu0 %v3711_v8, %s3314_s19 }
 0xb61   : > { %2924 = vrot.lane.b32.xlu1 %v2923_v19, %s3315_s11 }
 0xb62   : > { %2934 = vrot.lane.b32.xlu0 %v2933_v32, %s3316_s15 }
 0xb65   : > { %2929 = vrot.lane.b32.xlu1 %v2928_v14, %s3315_s11 }
 0xb69   : > { %2939 = vrot.lane.b32.xlu1 %v2938_v27, %s3316_s15 }
 0xbd1   : > { %v1735_v1 = vpop.xlane.xlu0 %1734 }
 0xbd2   : > { %3027 = vrcp.f32 %v1735_v1 }
 0xbd5   : > { %v1729_v3 = vpop.xlane.xlu0 %1728  ;;  %v1738_v6 = vpop.xlane.xlu1 %1737 }
 0xbd6   : > { %3029 = vrcp.f32 %v1738_v6 }
 0xbd7   : > { %3031 = vrcp.f32 %v1729_v3  ;;  %v3060_v3 = vld [vmem:[#allocation2] sm:$0xff] }
 0xbd9   : > { %v1750_v8 = vpop.permute.xlu0 %1749  ;;  %v1732_v5 = vpop.xlane.xlu1 %1731 }
 0xbda   : > { %3033 = vrcp.f32 %v1732_v5  ;;  %2799 = vmatpush3.bf16.msra.mxu1 %v1750_v8 }
 0xbdb   : > { %2810 = vmatprep.subr.bf16.mxu1 %v2955_v22 }
 0xbdc   : > { %v3028_v18 = vpop.eup %3027 }
 0xbdd   : > { %v1797_v16 = vpop.permute.xlu1 %1796  ;;  %v1745_v9 = vmul.f32 %v3028_v18, %v3020_v57  ;;  %v2935_v42 = vpop.permute.xlu0 %2934  ;;  %v3061_v18 = vld [vmem:[#allocation2 + $0x8] sm:$0xff] }
 0xbde   : > { %2805 = vmatpush3.bf16.msra.mxu0 %v1797_v16  ;;  %v2937_v52 = vunpack.i.h.bf16 %v2935_v42  ;;  %v2936_v53 = vunpack.i.l.bf16 %v2935_v42  ;;  %v2957_v42 = vld [vmem:[%s3628_s16] sm:$0xff]  }
 0xbdf   : > { %2818 = vmatprep.subr.bf16.mxu0 %v2957_v42 }
 0xbe0   : > { %v3030_v19 = vpop.eup %3029 }
 0xbe1   : > { %v3032_v11 = vpop.eup %3031  ;;  %v1746_v13 = vmul.f32 %v3030_v19, %v3024_v60  ;;  %v2925_v34 = vpop.permute.xlu1 %2924 }
 0xbe2   : > { %v1743_v17 = vmul.f32 %v3032_v11, %v3022_v59  ;;  %v2927_v39 = vunpack.i.h.bf16 %v2925_v34  ;;  %v2926_v40 = vunpack.i.l.bf16 %v2925_v34 }
 0xbe3   : > { %v1748_v15 = vpack.c.bf16 %v1746_v13, %v1745_v9  ;;  %v3062_v9 = vld [vmem:[#allocation2 + $0x18] sm:$0xff] }
 0xbe4   : > { %v3034_v14 = vpop.eup %3033  ;;  %v1892_v48 = vsel %vm878_vm3, %v3769_v12, %v2927_v39  ;;  %v1891_v49 = vsel %vm878_vm3, %v3767_v10, %v2926_v40 }
 0xbe5   : > { %v1744_v20 = vmul.f32 %v3034_v14, %v3026_v63  ;;  %2807 = vmatmul.mubr.msk.bf16.vlgmr.msra.gmra.mrb[32].mxu0 %vm976_vm4, %v1748_v15  ;;  %v2930_v35 = vpop.permute.xlu1 %2929  ;;  %v1895_v12 = vsel %vm976_vm4, %v1891_v49, %v2936_v53  ;;  %v1896_v58 = vsel %vm976_vm4, %v1892_v48, %v2937_v52 }
 0xbe6   : > { %v2932_v37 = vunpack.i.h.bf16 %v2930_v35  ;;  %v2931_v38 = vunpack.i.l.bf16 %v2930_v35  ;;  %2819 = vmatpush3.bf16.msra.mxu0 %v2957_v42 }
 0xbe7   : > { %v1747_v21 = vpack.c.bf16 %v1744_v20, %v1743_v17 }
 0xbe8   : > { %v1894_v44 = vsel %vm878_vm3, %v3765_v7, %v2932_v37  ;;  %v1893_v45 = vsel %vm878_vm3, %v3763_v4, %v2931_v38 }
 0xbe9   : > { %2801 = vmatmul.mubr.msk.bf16.vlgmr.msra.gmra.mrb[28].mxu1 %vm976_vm4, %v1747_v21  ;;  %v2940_v36 = vpop.permute.xlu1 %2939 }
 0xbea   : > { %2811 = vmatpush3.bf16.msra.mxu1 %v2955_v22  ;;  %v2942_v2 = vunpack.i.h.bf16 %v2940_v36  ;;  %v2941_v41 = vunpack.i.l.bf16 %v2940_v36 }
 0xbeb   : > { %2812 = vmatprep.subr.bf16.mxu1 %v2956_v23 }
 0xbec   : > { %v1897_v50 = vsel %vm976_vm4, %v1893_v45, %v2941_v41  ;;  %v1898_v51 = vsel %vm976_vm4, %v1894_v44, %v2942_v2 }
 0xbee   : > { %2813 = vmatpush3.bf16.msra.mxu1 %v2956_v23 }
 0xcb8   : > { %v1836_v24 = vpop.f32.mrb[32].mxu0 }
 0xcb9   : > { %v2808_v25 = vpop.f32.mrb[33].mxu0 }
 0xcba   : > { %v1839_v26 = vpop.f32.mrb[34].mxu0 }
 0xcbb   : > { %v2948_v27 = vpack.i.bf16 %v1839_v26, %v1836_v24  ;;  %v2809_v28 = vpop.f32.mrb[35].mxu0 }
 0xcbc   : > { %v1789_v29 = vpop.f32.mrb[28].mxu1 }
 0xcbd   : > { %v2802_v30 = vpop.f32.mrb[29].mxu1  ;;  %2949 = vrot.lane.b32.xlu1 %v2948_v27, %s3317_s6 }
 0xcbe   : > { %v1792_v31 = vpop.f32.mrb[30].mxu1 }
 0xcbf   : > { %v2943_v32 = vpack.i.bf16 %v1792_v31, %v1789_v29  ;;  %v2803_v33 = vpop.f32.mrb[31].mxu1 }
 0xcc1   : > { %2944 = vrot.lane.b32.xlu0 %v2943_v32, %s3317_s6 }
 0xd2f   : > { %v2950_v43 = vpop.permute.xlu1 %2949 }
 0xd30   : > { %v2952_v46 = vunpack.i.h.bf16 %v2950_v43  ;;  %v2951_v47 = vunpack.i.l.bf16 %v2950_v43  ;;  %v2958_v43 = vld [vmem:[%s3628_s16 + $0x8] sm:$0xff]   ;;  %s4060_s16 = scalar_lea.vmem [#allocation6], %s3612_s18 }
 0xd31   : > { %2820 = vmatprep.subr.bf16.mxu0 %v2958_v43 }
 0xd32   : > { %v1902_v7 = vsel %vm1899_vm5, %v1897_v50, %v2951_v47  ;;  %v1903_v54 = vsel %vm1899_vm5, %v1898_v51, %v2952_v46  ;;  %2821 = vmatpush3.bf16.msra.mxu0 %v2958_v43 }
 0xd33   : > { %v2945_v4 = vpop.permute.xlu0 %2944  ;;  %v1905_v55 = vpack.c.bf16 %v1903_v54, %v1902_v7 }
 0xd34   : > { %v2947_v56 = vunpack.i.h.bf16 %v2945_v4  ;;  %v2946_v57 = vunpack.i.l.bf16 %v2945_v4 }
 0xd36   : > { %v1901_v10 = vsel %vm1899_vm5, %v1896_v58, %v2947_v56  ;;  %v1900_v59 = vsel %vm1899_vm5, %v1895_v12, %v2946_v57 }
 0xd37   : > { %v1904_v60 = vpack.c.bf16 %v1901_v10, %v1900_v59  ;;  %v2628_v59 = vld [vmem:[%s4061_s29] ss:$0 sm:$0xff] }
 0xd39   : > { %2814 = vmatprep.mubr.msk.bf16.mxu1 %vm726_vm1, %v1904_v60 }
 0xd3a   : > { %2815 = vmatmul.mubr.msk.bf16.vlgmr.msra.gmra.mrb[32].mxu1 %vm726_vm1, %v1905_v55  ;;  %v2627_v55 = vld [vmem:[%s4060_s16] ss:$0 sm:$0xff] }
 0xe0d   : > { %v2816_v61 = vpop.f32.mrb[32].mxu1 }
 0xe0e   : > { %v1962_v63 = vpop.f32.mrb[33].mxu1  ;;  %v1979_v1 = vadd.f32 %v3059_v0, %v2816_v61 }
 0xe0f   : > { %v1977_v6 = vadd.f32 %v3060_v3, %v1962_v63  ;;  %v2817_v8 = vpop.f32.mrb[34].mxu1 }
 0xe10   : > { %v1965_v5 = vpop.f32.mrb[35].mxu1  ;;  %v3899_v11 = vadd.f32 %v2626_v62, %v1979_v1  ;;  %v1980_v13 = vadd.f32 %v3062_v9, %v2817_v8  ;;  %v2959_v9 = vld [vmem:[%s3661_s10] sm:$0xff]  }
 0xe11   : > { %v3897_v16 = vadd.f32 %v2626_v62, %v1977_v6  ;;  %v1978_v19 = vadd.f32 %v3061_v18, %v1965_v5  ;;  %2826 = vmatprep.subr.bf16.mxu1 %v2959_v9 }
 0xe12   : > { %v3907_v20 = vadd.f32 %v2626_v62, %v1980_v13  ;;  %v2000_v21 = vsel %vm726_vm1, %v3899_v11, 0.0  ;;  %2827 = vmatpush3.bf16.msra.mxu1 %v2959_v9  ;;  %v2960_v13 = vld [vmem:[%s3661_s10 + $0x8] sm:$0xff]  }
 0xe13   : > { %v3901_v14 = vadd.f32 %v2626_v62, %v1978_v19  ;;  %v1994_v15 = vsel %vm726_vm1, %v3897_v16, 0.0  ;;  %2828 = vmatprep.subr.bf16.mxu1 %v2960_v13 }
 0xe14   : > { %1995 = vadd.xlane.f32.xlu0 %v1994_v15  ;;  %v2003_v22 = vsel %vm726_vm1, %v3907_v20, 0.0  ;;  %v2961_v15 = vld [vmem:[%s3661_s10 + $0x10] sm:$0xff]  }
 0xe15   : > { %v1997_v17 = vsel %vm726_vm1, %v3901_v14, 0.0 }
 0xe16   : > { %1998 = vadd.xlane.f32.xlu1 %v1997_v17  ;;  %2829 = vmatpush3.bf16.msra.mxu1 %v2960_v13  ;;  %v2629_v17 = vld [vmem:[%s602_s26] ss:$0 sm:$0xff] }
 0xe17   : > { %2830 = vmatprep.subr.bf16.mxu1 %v2961_v15 }
 0xe18   : > { %2001 = vadd.xlane.f32.xlu0 %v2000_v21  ;;  %v2962_v21 = vld [vmem:[%s3661_s10 + $0x18] sm:$0xff]  }
 0xe1a   : > { %2831 = vmatpush3.bf16.msra.mxu1 %v2961_v15 }
 0xe1b   : > { %2832 = vmatprep.subr.bf16.mxu1 %v2962_v21 }
 0xe1c   : > { %2004 = vadd.xlane.f32.xlu0 %v2003_v22 }
 0xe1e   : > { %2833 = vmatpush3.bf16.msra.mxu1 %v2962_v21 }
 0xea1   : > { %v1996_v23 = vpop.xlane.xlu0 %1995 }
 0xea2   : > { %v2006_v24 = vmul.f32 0.03125, %v1996_v23 }
 0xea3   : > { %v1999_v25 = vpop.xlane.xlu1 %1998 }
 0xea4   : > { %v2010_v26 = vsub.f32 %v3897_v16, %v2006_v24  ;;  %v2007_v27 = vmul.f32 0.03125, %v1999_v25 }
 0xea5   : > { %v2002_v28 = vpop.xlane.xlu0 %2001 }
 0xea6   : > { %v2011_v29 = vsub.f32 %v3901_v14, %v2007_v27  ;;  %v2008_v30 = vmul.f32 0.03125, %v2002_v28  ;;  %v2014_v31 = vmul.f32 %v2010_v26, %v2010_v26 }
 0xea8   : > { %v2012_v32 = vsub.f32 %v3899_v11, %v2008_v30  ;;  %v2018_v33 = vsel %vm726_vm1, %v2014_v31, 0.0  ;;  %v2015_v34 = vmul.f32 %v2011_v29, %v2011_v29 }
 0xea9   : > { %2019 = vadd.xlane.f32.xlu0 %v2018_v33  ;;  %v2005_v35 = vpop.xlane.xlu0 %2004 }
 0xeaa   : > { %v2009_v36 = vmul.f32 0.03125, %v2005_v35  ;;  %v2021_v37 = vsel %vm726_vm1, %v2015_v34, 0.0  ;;  %v2016_v38 = vmul.f32 %v2012_v32, %v2012_v32 }
 0xeab   : > { %2022 = vadd.xlane.f32.xlu1 %v2021_v37 }
 0xeac   : > { %v2013_v39 = vsub.f32 %v3907_v20, %v2009_v36  ;;  %v2024_v40 = vsel %vm726_vm1, %v2016_v38, 0.0 }
 0xead   : > { %2025 = vadd.xlane.f32.xlu0 %v2024_v40 }
 0xeae   : > { %v2017_v2 = vmul.f32 %v2013_v39, %v2013_v39 }
 0xeb0   : > { %v2027_v41 = vsel %vm726_vm1, %v2017_v2, 0.0 }
 0xeb1   : > { %2028 = vadd.xlane.f32.xlu1 %v2027_v41 }
 0xf36   : > { %v2020_v44 = vpop.xlane.xlu0 %2019 }
 0xf37   : > { %v2030_v45 = vmul.f32 0.03125, %v2020_v44 }
 0xf38   : > { %v2023_v46 = vpop.xlane.xlu1 %2022 }
 0xf39   : > { %v2034_v47 = vadd.f32 1e-05, %v2030_v45  ;;  %v2031_v48 = vmul.f32 0.03125, %v2023_v46 }
 0xf3a   : > { %v2026_v49 = vpop.xlane.xlu0 %2025 }
 0xf3b   : > { %3035 = vrsqrt.f32 %v2034_v47  ;;  %v2035_v50 = vadd.f32 1e-05, %v2031_v48  ;;  %v2032_v51 = vmul.f32 0.03125, %v2026_v49 }
 0xf3d   : > { %3037 = vrsqrt.f32 %v2035_v50  ;;  %v2036_v52 = vadd.f32 1e-05, %v2032_v51 }
 0xf3e   : > { %v2029_v53 = vpop.xlane.xlu1 %2028 }
 0xf3f   : > { %3039 = vrsqrt.f32 %v2036_v52  ;;  %v2033_v7 = vmul.f32 0.03125, %v2029_v53 }
 0xf41   : > { %v2037_v54 = vadd.f32 1e-05, %v2033_v7 }
 0xf43   : > { %3041 = vrsqrt.f32 %v2037_v54 }
 0xf45   : > { %v3036_v4 = vpop.eup %3035 }
 0xf46   : > { %v2042_v56 = vmul.f32 %v3036_v4, %v2010_v26 }
 0xf47   : > { %v3038_v57 = vpop.eup %3037 }
 0xf48   : > { %v2043_v12 = vmul.f32 %v3038_v57, %v2011_v29  ;;  %v2052_v58 = vmul.f32 %v2627_v55, %v2042_v56 }
 0xf49   : > { %v3040_v10 = vpop.eup %3039 }
 0xf4a   : > { %v2044_v60 = vmul.f32 %v3040_v10, %v2012_v32  ;;  %v2053_v61 = vmul.f32 %v2627_v55, %v2043_v12  ;;  %v2062_v62 = vadd.f32 %v2628_v59, %v2052_v58  ;;  %v2644_v12 = vld [vmem:[%s705_s24] ss:$0 sm:$0xff] }
 0xf4c   : > { %v2063_v63 = vadd.f32 %v2628_v59, %v2053_v61  ;;  %v2054_v1 = vmul.f32 %v2627_v55, %v2044_v60 }
 0xf4d   : > { %v3042_v0 = vpop.eup %3041 }
 0xf4e   : > { %v2045_v3 = vmul.f32 %v3042_v0, %v2013_v39  ;;  %v2066_v6 = vpack.c.bf16 %v2063_v63, %v2062_v62  ;;  %v2064_v5 = vadd.f32 %v2628_v59, %v2054_v1 }
 0xf50   : > { %v2055_v8 = vmul.f32 %v2627_v55, %v2045_v3  ;;  %2822 = vmatprep.mubr.msk.bf16.mxu0 %vm726_vm1, %v2066_v6 }
 0xf52   : > { %v2065_v18 = vadd.f32 %v2628_v59, %v2055_v8 }
 0xf54   : > { %v2067_v19 = vpack.c.bf16 %v2065_v18, %v2064_v5 }
 0xf56   : > { %2823 = vmatmul.mubr.msk.bf16.vlgmr.msra.gmra.mrb[36].mxu0 %vm726_vm1, %v2067_v19 }
0x1029   : > { %v2824_v22 = vpop.f32.mrb[36].mxu0 }
0x102a   : > { %v2140_v23 = vadd.f32 %v2824_v22, %v2629_v17  ;;  %v2131_v24 = vpop.f32.mrb[37].mxu0 }
0x102b   : > { %v2132_v25 = vadd.f32 %v2629_v17, %v2131_v24  ;;  %v2825_v26 = vpop.f32.mrb[38].mxu0 }
0x102c   : > { %2182 = vrot.lane.b32.xlu1 %v2140_v23, %s3305_s22  ;;  %v2134_v27 = vpop.f32.mrb[39].mxu0  ;;  %v2143_v29 = vadd.f32 %v2825_v26, %v2629_v17  ;;  %v2636_v32 = vmul.f32 -1.442695, %v2140_v23 }
0x102d   : > { %v2135_v28 = vadd.f32 %v2629_v17, %v2134_v27  ;;  %2178 = vrot.lane.b32.xlu0 %v2132_v25, %s3305_s22  ;;  %v2634_v30 = vmul.f32 -1.442695, %v2132_v25 }
0x102e   : > { %v2637_v33 = vmul.f32 -1.442695, %v2143_v29 }
0x102f   : > { %v2635_v31 = vmul.f32 -1.442695, %v2135_v28  ;;  %3043 = vpow2.f32 %v2634_v30 }
0x1030   : > { %2180 = vrot.lane.b32.xlu1 %v2135_v28, %s3305_s22 }
0x1031   : > { %3045 = vpow2.f32 %v2635_v31 }
0x1032   : > { %3047 = vpow2.f32 %v2636_v32 }
0x1033   : > { %3049 = vpow2.f32 %v2637_v33 }
0x1034   : > { %2184 = vrot.lane.b32.xlu1 %v2143_v29, %s3305_s22 }
0x1039   : > { %v3044_v34 = vpop.eup %3043 }
0x103a   : > { %v2158_v36 = vadd.f32 1.0, %v3044_v34 }
0x103b   : > { %v3046_v35 = vpop.eup %3045 }
0x103c   : > { %v3048_v37 = vpop.eup %3047  ;;  %v2159_v38 = vadd.f32 1.0, %v3046_v35  ;;  %3051 = vrcp.f32 %v2158_v36 }
0x103d   : > { %v3050_v39 = vpop.eup %3049  ;;  %v2160_v40 = vadd.f32 1.0, %v3048_v37 }
0x103e   : > { %v2161_v2 = vadd.f32 1.0, %v3050_v39  ;;  %3053 = vrcp.f32 %v2159_v38 }
0x103f   : > { %3055 = vrcp.f32 %v2160_v40 }
0x1040   : > { %3057 = vrcp.f32 %v2161_v2 }
0x1046   : > { %v3052_v41 = vpop.eup %3051 }
0x1047   : > { %v2170_v46 = vmul.f32 %v3052_v41, %v2132_v25 }
0x1048   : > { %v3054_v42 = vpop.eup %3053 }
0x1049   : > { %v3056_v45 = vpop.eup %3055  ;;  %v2171_v47 = vmul.f32 %v3054_v42, %v2135_v28 }
0x104a   : > { %v3058_v48 = vpop.eup %3057  ;;  %v2172_v52 = vmul.f32 %v3056_v45, %v2140_v23  ;;  %v2646_v45 = vld [vmem:[%s4063_s13] ss:$0 sm:$0xff] (!%p2645_p4) }
0x104b   : > { %v2173_v7 = vmul.f32 %v3058_v48, %v2143_v29 }
0x109e   : > { %v2183_v43 = vpop.permute.xlu1 %2182 }
0x109f   : > { %v2179_v44 = vpop.permute.xlu0 %2178  ;;  %v2192_v4 = vmul.f32 %v2183_v43, %v2172_v52 }
0x10a0   : > { %v2190_v50 = vmul.f32 %v2179_v44, %v2170_v46 }
0x10a2   : > { %v2181_v49 = vpop.permute.xlu1 %2180 }
0x10a3   : > { %v2191_v51 = vmul.f32 %v2181_v49, %v2171_v47  ;;  %v2647_v47 = vld [vmem:[%s4064_s21] ss:$0 sm:$0xff] (!%p2645_p4) }
0x10a5   : > { %v2194_v53 = vpack.c.bf16 %v2191_v51, %v2190_v50 }
0x10a6   : > { %v2185_v54 = vpop.permute.xlu1 %2184 }
0x10a7   : > { %v2193_v55 = vmul.f32 %v2185_v54, %v2173_v7  ;;  %2834 = vmatprep.mubr.msk.bf16.mxu1 %vm2228_vm6, %v2194_v53 }
0x10a9   : > { %v2195_v56 = vpack.c.bf16 %v2193_v55, %v2192_v4 }
0x10ab   : > { %2835 = vmatmul.mubr.msk.bf16.vlgmr.msra.gmra.mrb[36].mxu1 %vm2228_vm6, %v2195_v56 }
0x117e   : > { %v2836_v57 = vpop.f32.mrb[36].mxu1 }
0x117f   : > { %v2286_v58 = vadd.f32 %v2836_v57, %v3899_v11  ;;  %v2269_v10 = vpop.f32.mrb[37].mxu1 }
0x1180   : > { %v2284_v59 = vadd.f32 %v2269_v10, %v3897_v16  ;;  %v2837_v60 = vpop.f32.mrb[38].mxu1  ;;  %2306 = sbr.rel (%p2645_p4) target bundleno = 4806 (0x12c6), region = 104 }
0x1181   : > { %v2297_v61 = vadd.f32 %v2644_v12, %v2286_v58  ;;  %v2287_v62 = vadd.f32 %v2837_v60, %v3907_v20  ;;  %v2272_v63 = vpop.f32.mrb[39].mxu1 }
0x1182   : > { %v2295_v0 = vadd.f32 %v2644_v12, %v2284_v59  ;;  %v2285_v1 = vadd.f32 %v2272_v63, %v3901_v14 }
0x1183   : > { %2301 = vst.msk [vmem:[#allocation2 + $0x10] sm:$0xff] %vm726_vm1, %v2297_v61  ;;  %v2298_v3 = vadd.f32 %v2644_v12, %v2287_v62  ;;  %v2315_v11 = vsel (!%p2645_p4), %vm726_vm1, %v2297_v61, 0.0 }
0x1184   : > { %2299 = vst.msk [vmem:[#allocation2] sm:$0xff] %vm726_vm1, %v2295_v0  ;;  %v2296_v6 = vadd.f32 %v2644_v12, %v2285_v1  ;;  %v2309_v16 = vsel (!%p2645_p4), %vm726_vm1, %v2295_v0, 0.0  ;;  %2316 = vadd.xlane.f32.xlu1 (!%p2645_p4), %v2315_v11 }
0x1185   : > { %2302 = vst.msk [vmem:[#allocation2 + $0x18] sm:$0xff] %vm726_vm1, %v2298_v3  ;;  %2310 = vadd.xlane.f32.xlu0 (!%p2645_p4), %v2309_v16  ;;  %v2318_v20 = vsel (!%p2645_p4), %vm726_vm1, %v2298_v3, 0.0 }
0x1186   : > { %2300 = vst.msk [vmem:[#allocation2 + $0x8] sm:$0xff] %vm726_vm1, %v2296_v6  ;;  %v2312_v14 = vsel (!%p2645_p4), %vm726_vm1, %v2296_v6, 0.0 }
0x1188   : > { %2319 = vadd.xlane.f32.xlu1 %v2318_v20 }
0x1189   : > { %2313 = vadd.xlane.f32.xlu0 %v2312_v14 }
0x1211   : > { %v2317_v5 = vpop.xlane.xlu1 %2316 }
0x1212   : > { %v2311_v8 = vpop.xlane.xlu0 %2310  ;;  %v2323_v19 = vmul.f32 0.03125, %v2317_v5 }
0x1213   : > { %v2321_v18 = vmul.f32 0.03125, %v2311_v8 }
0x1214   : > { %v2327_v13 = vsub.f32 %v2297_v61, %v2323_v19 }
0x1215   : > { %v2325_v9 = vsub.f32 %v2295_v0, %v2321_v18  ;;  %v2320_v17 = vpop.xlane.xlu1 %2319 }
0x1216   : > { %v2314_v15 = vpop.xlane.xlu0 %2313  ;;  %v2324_v22 = vmul.f32 0.03125, %v2320_v17  ;;  %v2331_v24 = vmul.f32 %v2327_v13, %v2327_v13 }
0x1217   : > { %v2322_v21 = vmul.f32 0.03125, %v2314_v15  ;;  %v2329_v23 = vmul.f32 %v2325_v9, %v2325_v9 }
0x1218   : > { %v2328_v26 = vsub.f32 %v2298_v3, %v2324_v22  ;;  %v2339_v28 = vsel %vm726_vm1, %v2331_v24, 0.0 }
0x1219   : > { %v2326_v25 = vsub.f32 %v2296_v6, %v2322_v21  ;;  %v2333_v27 = vsel %vm726_vm1, %v2329_v23, 0.0 }
0x121a   : > { %2334 = vadd.xlane.f32.xlu0 %v2333_v27  ;;  %v2332_v30 = vmul.f32 %v2328_v26, %v2328_v26 }
0x121b   : > { %v2330_v29 = vmul.f32 %v2326_v25, %v2326_v25 }
0x121c   : > { %v2342_v32 = vsel %vm726_vm1, %v2332_v30, 0.0 }
0x121d   : > { %v2336_v31 = vsel %vm726_vm1, %v2330_v29, 0.0 }
0x121e   : > { %2340 = vadd.xlane.f32.xlu0 %v2339_v28  ;;  %2337 = vadd.xlane.f32.xlu1 %v2336_v31 }
0x1222   : > { %2343 = vadd.xlane.f32.xlu1 %v2342_v32 }
0x12a7   : > { %v2335_v33 = vpop.xlane.xlu0 %2334 }
0x12a8   : > { %v2345_v34 = vmul.f32 0.03125, %v2335_v33 }
0x12aa   : > { %v2349_v35 = vadd.f32 1e-05, %v2345_v34 }
0x12ab   : > { %v2338_v36 = vpop.xlane.xlu1 %2337  ;;  %v2341_v37 = vpop.xlane.xlu0 %2340 }
0x12ac   : > { %3063 = vrsqrt.f32 %v2349_v35  ;;  %v2346_v38 = vmul.f32 0.03125, %v2338_v36  ;;  %v2347_v39 = vmul.f32 0.03125, %v2341_v37 }
0x12ae   : > { %v2350_v40 = vadd.f32 1e-05, %v2346_v38  ;;  %v2351_v2 = vadd.f32 1e-05, %v2347_v39 }
0x12af   : > { %v2344_v41 = vpop.xlane.xlu1 %2343 }
0x12b0   : > { %3065 = vrsqrt.f32 %v2350_v40  ;;  %v2348_v42 = vmul.f32 0.03125, %v2344_v41 }
0x12b1   : > { %3067 = vrsqrt.f32 %v2351_v2 }
0x12b2   : > { %v2352_v43 = vadd.f32 1e-05, %v2348_v42 }
0x12b4   : > { %3069 = vrsqrt.f32 %v2352_v43 }
0x12b6   : > { %v3064_v44 = vpop.eup %3063 }
0x12b7   : > { %v2357_v46 = vmul.f32 %v3064_v44, %v2325_v9 }
0x12b9   : > { %v2367_v48 = vmul.f32 %v2646_v45, %v2357_v46 }
0x12ba   : > { %v3066_v49 = vpop.eup %3065 }
0x12bb   : > { %v3068_v50 = vpop.eup %3067  ;;  %v2377_v51 = vadd.f32 %v2647_v47, %v2367_v48  ;;  %v2358_v52 = vmul.f32 %v3066_v49, %v2326_v25 }
0x12bc   : > { %v2359_v53 = vmul.f32 %v3068_v50, %v2327_v13 }
0x12bd   : > { %2381 = vst.msk [vmem:[#allocation12] sm:$0xff] %vm726_vm1, %v2377_v51  ;;  %v2368_v7 = vmul.f32 %v2646_v45, %v2358_v52 }
0x12be   : > { %v3070_v54 = vpop.eup %3069  ;;  %v2369_v4 = vmul.f32 %v2646_v45, %v2359_v53 }
0x12bf   : > { %v2378_v55 = vadd.f32 %v2647_v47, %v2368_v7  ;;  %v2360_v56 = vmul.f32 %v3070_v54, %v2328_v26 }
0x12c0   : > { %v2379_v57 = vadd.f32 %v2647_v47, %v2369_v4 }
0x12c1   : > { %2382 = vst.msk [vmem:[#allocation12 + $0x8] sm:$0xff] %vm726_vm1, %v2378_v55  ;;  %v2370_v12 = vmul.f32 %v2646_v45, %v2360_v56 }
0x12c2   : > { %2383 = vst.msk [vmem:[#allocation12 + $0x10] sm:$0xff] %vm726_vm1, %v2379_v57 }
0x12c3   : > { %v2380_v58 = vadd.f32 %v2647_v47, %v2370_v12 }
0x12c5   : > { %2384 = vst.msk [vmem:[#allocation12 + $0x18] sm:$0xff] %vm726_vm1, %v2380_v58 }
0x12c6 PF: > { %p2869_p11 = scmp.eq.s32.totalorder %s3414_s17, 1  ;;  %s3318_s23 = smov [#allocation12]  }
0x12c7   : > { %s2391_s0 = sshll.u32 %s3318_s23, 4  ;;  %s2392_s0 = int_to_ptr.vmem [resolvable:$true] %s2391_s0 }
0x12c8   : > { %s3221_s12 = scalar_lea.vmem %s2392_s0, 512  ;;  %p3228_p1 = scmp.lt.s32.totalorder %s2392_s0, %s2392_s0 }
0x12c9   : > { %p3222_p13 = scmp.ne.s32.totalorder %s2392_s0, %s3221_s12  ;;  %p3229_p12 = scmp.lt.s32.totalorder %s3221_s12, %s3221_s12 }
0x12cb   : > { %p3223_p9 = pnand %p3222_p13, %p2869_p11  ;;  %p3230_p3 = por %p3229_p12, %p3228_p1 }
0x12cd   : > { %p3224_p0 = pneg %p3223_p9 }
0x12cf   : > { %p3231_p5 = pnand %p3230_p3, %p3224_p0 }
0x12d1   : > { %3234 = shalt.err (!%p3231_p5)
}
0x12d2   : > { %s4065_s20 = sld [smem:[#allocation28_spill]] }
0x12d8   : > { %s3235_s19 = scalar_lea.hbm %s4065_s20, 512 }
0x12d9   : > { %p3236_p6 = scmp.ne.s32.totalorder %s4065_s20, %s3235_s19  ;;  %p3241_p7 = scmp.lt.u32.totalorder %s3235_s19, %s4065_s20 }
0x12db   : > { %p3237_p8 = pnand %p3236_p6, %p2869_p11 }
0x12dd   : > { %p3238_p10 = pneg %p3237_p8 }
0x12df   : > { %p3243_p2 = pnand %p3241_p7, %p3238_p10 }
0x12e1   : > { %3246 = shalt.err (!%p3243_p2)
}
0x12e2   : > { %s3319_s29 = smov 128  }
0x12e3   : > { %2849 = dma.vmem_to_hbm [thread:$0]  (%p2869_p11), %s2392_s0, 512, %s4065_s20, [#allocation5], %s3319_s29, %s3319_s29, %s3315_s11  }
0x12e4   : > { %3276 = dma.done.wait (%p2869_p11), [#allocation5], 512  }
0x12e5   : > { %3278 = vsyncadd (%p2869_p11), [#allocation5], 4294966784 }
0x12e6 PF: > { %s4066_s16 = sld [smem:[#allocation18_spill]]  ;;  %s4067_s10 = sld [smem:[#allocation17_spill]] }
0x12e7   : > { %s4068_s15 = sld [smem:[#allocation19_spill]]  ;;  %s4069_s29 = smov %s3285_s30 }
0x12ec   : > { %p31_p4 = scmp.ge.s32.totalorder %s4066_s16, 4   ;;  %s4070_s30 = smov %s4067_s10 }
0x12ee   :  { %33 = sbr.rel (!%p31_p4) target bundleno = 18 (0x12), region = 187 }
0x12f5   :  { %2407 = vsyncpa [#allocation4], 1 }
0x12f6   :  { %2409 = vsyncpa [#allocation4 + $0x1], 1 }
0x12f7   :  { %2410 = vsyncpa [#allocation7], 1 }
0x12f8   :  { %2412 = vsyncpa [#allocation7 + $0x1], 1 }
0x12f9   :  { %2413 = vsyncpa [#allocation10], 1 }
0x12fa   :  { %2415 = vsyncpa [#allocation10 + $0x1], 1 }
0x12fb   :  { %2416 = vsyncpa [#allocation5], 1 }
0x12fc   :  { %2418 = vsyncpa [#allocation5 + $0x1], 1 }

</bundles_post_ra>
